<compile_context>
chip_gen: v6e
topology: v6e:2x2x1
jax: 0.10.0
libtpu: 0.0.40
codegen_flags: <defaults>
</compile_context>

<pallas_src>
import jax
import jax.numpy as jnp
from jax.experimental import pallas as pl
from jax.experimental.pallas import tpu as pltpu

IN_FEATURES = 768
OUT_FEATURES = 768


def _dense_kernel(x_ref, wt_ref, o_ref):
    # Identity activation == plain cast back to the output dtype.
    w = wt_ref[...]
    x = x_ref[...].astype(w.dtype)          # bf16 x bf16 -> single-pass MXU
    o_ref[...] = jnp.dot(
        x, w, preferred_element_type=jnp.float32
    ).astype(o_ref.dtype)


def prepare_weight(weight, dtype=jnp.bfloat16):
    """One-time (init-time) prep: PyTorch [out, in] -> [in, out], bf16 storage."""
    return jnp.asarray(weight).T.astype(dtype)


def _device_kind():
    try:
        return jax.devices()[0].device_kind.lower()
    except Exception:
        return ""


def _pallas_dense(x, w_t, *, single_buffer_w):
    M, K = x.shape
    K2, N = w_t.shape
    assert K == IN_FEATURES and K2 == IN_FEATURES and N == OUT_FEATURES

    kind = _device_kind()
    two_tensorcores = "v7" in kind                      # v7x: 2 TCs / chip
    w_pipeline = pl.Buffered(buffer_count=1) if single_buffer_w else None

    if two_tensorcores and M <= 512:
        # Small-M on v7x: one M block, N split into two lane-dense 384-wide
        # halves so each TensorCore DMAs and computes half of W.
        tn = N // 2                                     # 384 = 3 * 128
        tm = M
        grid = (2,)
        in_specs = [
            pl.BlockSpec((M, K), lambda j: (0, 0)),
            pl.BlockSpec((K, tn), lambda j: (0, j), pipeline_mode=w_pipeline),
        ]
        out_specs = pl.BlockSpec((M, tn), lambda j: (0, j))
    else:
        # Full-width N (lane-dense 768 output); tile (and, on multi-core
        # chips, shard) over M only.
        if M <= 512:
            tm = M
        elif "v6" in kind or "v7" in kind:
            tm = 1024      # ~14 MB footprint with bf16 W: fits scoped VMEM
        else:
            tm = 512       # v5e scoped-VMEM default is 16 MB; stay safe
        grid = (pl.cdiv(M, tm),)
        in_specs = [
            pl.BlockSpec((tm, K), lambda i: (i, 0)),
            # W block index is grid-invariant -> DMA'd once; single buffer.
            pl.BlockSpec((K, N), lambda i: (0, 0), pipeline_mode=w_pipeline),
        ]
        out_specs = pl.BlockSpec((tm, N), lambda i: (i, 0))

    cost = pl.CostEstimate(
        flops=2 * M * N * K,
        transcendentals=0,
        bytes_accessed=(
            x.dtype.itemsize * M * K
            + w_t.dtype.itemsize * K * N
            + x.dtype.itemsize * M * N
        ),
    )

    compiler_params = pltpu.CompilerParams(
        dimension_semantics=("parallel",),
        vmem_limit_bytes=(40 << 20) if tm >= 1024 else None,
    )

    return pl.pallas_call(
        _dense_kernel,
        out_shape=jax.ShapeDtypeStruct((M, N), x.dtype),
        grid_spec=pltpu.PrefetchScalarGridSpec(
            num_scalar_prefetch=0,
            grid=grid,
            in_specs=in_specs,
            out_specs=out_specs,
        ),
        compiler_params=compiler_params,
        cost_estimate=cost,
    )(x, w_t)


def dense_forward(x, w_t):
    """y = x @ w_t  (== x @ weight.T for the bias-free Linear + Identity).

    x:   [M, 768]   activations (output keeps x.dtype)
    w_t: [768, 768] weight already in [in_features, out_features] layout
                    (see prepare_weight), ideally bf16.

    NOTE: for tiny M this op is launch-overhead dominated; it pays off when
    called inside a larger jitted region so the custom-call cost amortizes.
    """
    try:
        return _pallas_dense(x, w_t, single_buffer_w=True)
    except Exception:
        # TODO(synk): remove fallback once pl.Buffered(1) is guaranteed on
        # every deployed jax version; semantics are identical either way.
        return _pallas_dense(x, w_t, single_buffer_w=False)


if __name__ == "__main__":
    key = jax.random.PRNGKey(0)
    k_x, k_w = jax.random.split(key)

    batch = 8
    # Deterministic synthetic parameters (no checkpoint load).
    x = jax.random.normal(k_x, (batch, IN_FEATURES), dtype=jnp.float32)
    weight = (
        jax.random.normal(k_w, (OUT_FEATURES, IN_FEATURES), dtype=jnp.float32)
        * (1.0 / jnp.sqrt(IN_FEATURES))
    )

    # One-time layout + dtype prep outside the hot path (as at init time).
    w_t = prepare_weight(weight)            # [768, 768], bf16
    jax.block_until_ready(w_t)

    y = dense_forward(x, w_t)
    jax.block_until_ready(y)

    assert y.shape == (batch, OUT_FEATURES)
    assert y.dtype == x.dtype

    # Reference at matching precision (bf16 inputs, f32 accumulation).
    y_ref = x.astype(jnp.bfloat16).astype(jnp.float32) @ w_t.astype(jnp.float32)
    assert jnp.allclose(y, y_ref, atol=1e-2, rtol=1e-2)

    # Sanity check against the exact f32 module forward (loose tol: bf16 W).
    y_f32 = x @ weight.T
    assert jnp.allclose(y, y_f32, atol=5e-2, rtol=5e-2)

    print("KERNEL_OK")
</pallas_src>

<mosaic_0001>
module attributes {stable_mosaic.version = 11 : i64} {
  func.func @_dense_kernel(%arg0: i32, %arg1: memref<8x768xf32, #tpu.memory_space<vmem>>, %arg2: memref<768x768xbf16, #tpu.memory_space<vmem>>, %arg3: memref<8x768xf32, #tpu.memory_space<vmem>>) attributes {dimension_semantics = [#tpu.dimension_semantics<parallel>], iteration_bounds = array<i64: 1>, scalar_prefetch = 0 : i64, scratch_operands = 0 : i64, tpu.core_type = #tpu.core_type<tc>, window_params = [{transform_indices = @transform_0, window_bounds = array<i64: 8, 768>}, {pipeline_mode = #tpu.pipeline_mode<synchronous>, transform_indices = @transform_1, window_bounds = array<i64: 768, 768>}, {transform_indices = @transform_2, window_bounds = array<i64: 8, 768>}]} {
    %c0 = arith.constant 0 : index
    %c0_0 = arith.constant 0 : index
    %0 = vector.load %arg2[%c0, %c0_0] : memref<768x768xbf16, #tpu.memory_space<vmem>>, vector<768x768xbf16>
    %c0_1 = arith.constant 0 : index
    %c0_2 = arith.constant 0 : index
    %1 = vector.load %arg1[%c0_1, %c0_2] : memref<8x768xf32, #tpu.memory_space<vmem>>, vector<8x768xf32>
    %2 = arith.truncf %1 : vector<8x768xf32> to vector<8x768xbf16>
    %cst = arith.constant dense<0.000000e+00> : vector<8x768xf32>
    %3 = tpu.matmul %2, %0, %cst {dimension_numbers = #tpu.dot_dimension_numbers<[1], [0], [0], [1], [0, 0, 1, 1], [], []>} : vector<8x768xbf16>, vector<768x768xbf16>, vector<8x768xf32> -> vector<8x768xf32>
    %c0_3 = arith.constant 0 : index
    %c0_4 = arith.constant 0 : index
    %4 = vector.load %arg3[%c0_3, %c0_4] : memref<8x768xf32, #tpu.memory_space<vmem>>, vector<8x768xf32>
    tpu.vector_store %arg3[%c0_3, %c0_4], %3 {strides = array<i32>} : memref<8x768xf32, #tpu.memory_space<vmem>>, vector<8x768xf32>,
    return
  }
  func.func @transform_0(%arg0: i32) -> (i32, i32) {
    %c0_i32 = arith.constant 0 : i32
    %c0_i32_0 = arith.constant 0 : i32
    return %arg0, %c0_i32 : i32, i32
  }
  func.func @transform_1(%arg0: i32) -> (i32, i32) {
    %c0_i32 = arith.constant 0 : i32
    %c0_i32_0 = arith.constant 0 : i32
    %c0_i32_1 = arith.constant 0 : i32
    return %c0_i32, %c0_i32_0 : i32, i32
  }
  func.func @transform_2(%arg0: i32) -> (i32, i32) {
    %c0_i32 = arith.constant 0 : i32
    %c0_i32_0 = arith.constant 0 : i32
    return %arg0, %c0_i32 : i32, i32
  }
}

module attributes {stable_mosaic.version = 11 : i64} {
  func.func @_dense_kernel(%arg0: i32, %arg1: memref<8x768xf32, #tpu.memory_space<vmem>>, %arg2: memref<768x768xbf16, #tpu.memory_space<vmem>>, %arg3: memref<8x768xf32, #tpu.memory_space<vmem>>) attributes {dimension_semantics = [#tpu.dimension_semantics<parallel>], iteration_bounds = array<i64: 1>, scalar_prefetch = 0 : i64, scratch_operands = 0 : i64, tpu.core_type = #tpu.core_type<tc>, window_params = [{transform_indices = @transform_0, window_bounds = array<i64: 8, 768>}, {pipeline_mode = #tpu.pipeline_mode<synchronous>, transform_indices = @transform_1, window_bounds = array<i64: 768, 768>}, {transform_indices = @transform_2, window_bounds = array<i64: 8, 768>}]} {
    %c0 = arith.constant 0 : index
    %c0_0 = arith.constant 0 : index
    %0 = vector.load %arg2[%c0, %c0_0] : memref<768x768xbf16, #tpu.memory_space<vmem>>, vector<768x768xbf16>
    %c0_1 = arith.constant 0 : index
    %c0_2 = arith.constant 0 : index
    %1 = vector.load %arg1[%c0_1, %c0_2] : memref<8x768xf32, #tpu.memory_space<vmem>>, vector<8x768xf32>
    %2 = arith.truncf %1 : vector<8x768xf32> to vector<8x768xbf16>
    %cst = arith.constant dense<0.000000e+00> : vector<8x768xf32>
    %3 = tpu.matmul %2, %0, %cst {dimension_numbers = #tpu.dot_dimension_numbers<[1], [0], [0], [1], [0, 0, 1, 1], [], []>} : vector<8x768xbf16>, vector<768x768xbf16>, vector<8x768xf32> -> vector<8x768xf32>
    %c0_3 = arith.constant 0 : index
    %c0_4 = arith.constant 0 : index
    %4 = vector.load %arg3[%c0_3, %c0_4] : memref<8x768xf32, #tpu.memory_space<vmem>>, vector<8x768xf32>
    tpu.vector_store %arg3[%c0_3, %c0_4], %3 {strides = array<i32>} : memref<8x768xf32, #tpu.memory_space<vmem>>, vector<8x768xf32>,
    return
  }
  func.func @transform_0(%arg0: i32) -> (i32, i32) {
    %c0_i32 = arith.constant 0 : i32
    %c0_i32_0 = arith.constant 0 : i32
    return %arg0, %c0_i32 : i32, i32
  }
  func.func @transform_1(%arg0: i32) -> (i32, i32) {
    %c0_i32 = arith.constant 0 : i32
    %c0_i32_0 = arith.constant 0 : i32
    %c0_i32_1 = arith.constant 0 : i32
    return %c0_i32, %c0_i32_0 : i32, i32
  }
  func.func @transform_2(%arg0: i32) -> (i32, i32) {
    %c0_i32 = arith.constant 0 : i32
    %c0_i32_0 = arith.constant 0 : i32
    return %arg0, %c0_i32 : i32, i32
  }
}

</mosaic_0001>

<bundles_post_ra>
// kernel: tpu_custom_call.1
= control target key start
LH: loop header
LB: loop body
LE: loop exit
PB: predicated region body
PF: predicated region fallthrough
CT: control target
= control target key end

     0   :  { %7 = vsyncpa [#allocation3], 0  ;;  %s3031_s0 = inlined_call_operand.hbm [shape: f32[8,768], index: 0, kind: input, shape index: {}]   ;;  %s3032_s1 = inlined_call_operand.hbm [shape: bf16[768,768], index: 1, kind: input, shape index: {}]   ;;  %s3033_s2 = inlined_call_operand.hbm [shape: f32[8,768], index: 2, kind: output, shape index: {}]  }
   0x1   :  { %8 = vsyncpa [#allocation6], 0 }
   0x2   :  { %9 = vsyncpa [#allocation4], 0  ;;  %s2960_s9 = smov [#allocation2]   ;;  %s2961_s11 = smov [#allocation5]  }
   0x3   :  { %s16_s10 = sshll.u32 %s2960_s9, 4  ;;  %s25_s12 = sshll.u32 %s2961_s11, 4  ;;  %s17_s10 = int_to_ptr.vmem [resolvable:$true] %s16_s10  ;;  %s26_s12 = int_to_ptr.vmem [resolvable:$true] %s25_s12 }
   0x4   :  { %s2902_s13 = scalar_lea.vmem %s17_s10, 768  ;;  %p2907_p1 = scmp.lt.s32.totalorder %s17_s10, %s17_s10 }
   0x5   :  { %p2903_p0 = scmp.ne.s32.totalorder %s17_s10, %s2902_s13  ;;  %p2908_p2 = scmp.lt.s32.totalorder %s2902_s13, %s2902_s13 }
   0x7   :  { %p2909_p3 = por %p2908_p2, %p2907_p1 }
   0x9   :  { %p2910_p4 = pnand %p2909_p3, %p2903_p0 }
   0xb   :  { %2913 = shalt.err (!%p2910_p4)
}
   0xc   :  { %19 = dma.hbm_to_vmem [thread:$0]  %s3031_s0, 768, %s17_s10, [#allocation3]  }
   0xd   :  { %s2922_s16 = scalar_lea.vmem %s26_s12, 36864  ;;  %p2927_p6 = scmp.lt.s32.totalorder %s26_s12, %s26_s12 }
   0xe   :  { %p2923_p5 = scmp.ne.s32.totalorder %s26_s12, %s2922_s16  ;;  %p2928_p7 = scmp.lt.s32.totalorder %s2922_s16, %s2922_s16 }
  0x10   :  { %p2929_p8 = por %p2928_p7, %p2927_p6 }
  0x12   :  { %p2930_p9 = pnand %p2929_p8, %p2923_p5 }
  0x14   :  { %2933 = shalt.err (!%p2930_p9)
}
  0x15   :  { %s2962_s17 = smov 384   ;;  %s2963_s18 = smov 24  }
  0x16   :  { %31 = dma.hbm_to_vmem [thread:$0]  %s3032_s1, 36864, %s26_s12, [#allocation6], %s2962_s17, %s2962_s17, %s2963_s18  }
  0x17   :  { %2954 = dma.done.wait [#allocation3], 768  }
  0x18   :  { %2955 = vsyncadd [#allocation3], 4294966528 }
  0x19   :  { %2956 = dma.done.wait [#allocation6], 36864  }
  0x1a   :  { %2957 = vsyncadd [#allocation6], 4294930432  ;;  %v2462_v0 = vld [vmem:[#allocation5 + $0x154] ss:$24 sps:$4 sm:$0xff]   ;;  %v2466_v2 = vld [vmem:[#allocation5 + $0x150] ss:$24 sps:$4 sm:$0xff]  }
  0x1b   :  { %v2464_v1 = vld [vmem:[#allocation5 + $0x454] ss:$24 sps:$4 sm:$0xff]   ;;  %1778 = vmatprep.subr.bf16.mxu0 %v2462_v0  ;;  %v2467_v3 = vld [vmem:[#allocation5 + $0x450] ss:$24 sps:$4 sm:$0xff]   ;;  %v2468_v4 = vld [vmem:[#allocation5 + $0x124] ss:$24 sps:$4 sm:$0xff]  }
  0x1c   :  { %1819 = vmatprep.subr.bf16.mxu1 %v2464_v1  ;;  %1779 = vmatpush1.bf16.msra.mxu0 %v2466_v2  ;;  %v2470_v5 = vld [vmem:[#allocation5 + $0x424] ss:$24 sps:$4 sm:$0xff]   ;;  %v2472_v6 = vld [vmem:[#allocation5 + $0x120] ss:$24 sps:$4 sm:$0xff]   ;;  %v2474_v8 = vld [vmem:[#allocation5 + $0xf4] ss:$24 sps:$4 sm:$0xff]  }
  0x1d   :  { %1820 = vmatpush1.bf16.msra.mxu1 %v2467_v3  ;;  %1780 = vmatprep.subr.bf16.mxu0 %v2468_v4  ;;  %v2473_v7 = vld [vmem:[#allocation5 + $0x420] ss:$24 sps:$4 sm:$0xff]   ;;  %v2476_v9 = vld [vmem:[#allocation5 + $0x3f4] ss:$24 sps:$4 sm:$0xff]   ;;  %v2478_v10 = vld [vmem:[#allocation5 + $0xf0] ss:$24 sps:$4 sm:$0xff]  }
  0x1e   :  { %1821 = vmatprep.subr.bf16.mxu1 %v2470_v5  ;;  %v2479_v11 = vld [vmem:[#allocation5 + $0x3f0] ss:$24 sps:$4 sm:$0xff]   ;;  %v2480_v12 = vld [vmem:[#allocation5 + $0xc4] ss:$24 sps:$4 sm:$0xff]   ;;  %v2484_v14 = vld [vmem:[#allocation5 + $0xc0] ss:$24 sps:$4 sm:$0xff]  }
  0x1f   :  { %v2482_v13 = vld [vmem:[#allocation5 + $0x3c4] ss:$24 sps:$4 sm:$0xff]   ;;  %v2485_v15 = vld [vmem:[#allocation5 + $0x3c0] ss:$24 sps:$4 sm:$0xff]   ;;  %v2486_v16 = vld [vmem:[#allocation5 + $0x94] ss:$24 sps:$4 sm:$0xff]  }
  0x20   :  { %1781 = vmatpush1.bf16.msra.mxu0 %v2472_v6  ;;  %v2488_v17 = vld [vmem:[#allocation5 + $0x394] ss:$24 sps:$4 sm:$0xff]   ;;  %v2490_v18 = vld [vmem:[#allocation5 + $0x90] ss:$24 sps:$4 sm:$0xff]   ;;  %v2492_v20 = vld [vmem:[#allocation5 + $0x64] ss:$24 sps:$4 sm:$0xff]  }
  0x21   :  { %1822 = vmatpush1.bf16.msra.mxu1 %v2473_v7  ;;  %1782 = vmatprep.subr.bf16.mxu0 %v2474_v8  ;;  %v2491_v19 = vld [vmem:[#allocation5 + $0x390] ss:$24 sps:$4 sm:$0xff]   ;;  %v2494_v21 = vld [vmem:[#allocation5 + $0x364] ss:$24 sps:$4 sm:$0xff]   ;;  %v2496_v22 = vld [vmem:[#allocation5 + $0x60] ss:$24 sps:$4 sm:$0xff]  }
  0x22   :  { %1823 = vmatprep.subr.bf16.mxu1 %v2476_v9  ;;  %v2497_v23 = vld [vmem:[#allocation5 + $0x360] ss:$24 sps:$4 sm:$0xff]   ;;  %v2498_v24 = vld [vmem:[#allocation5 + $0x34] ss:$24 sps:$4 sm:$0xff]   ;;  %v2502_v26 = vld [vmem:[#allocation5 + $0x30] ss:$24 sps:$4 sm:$0xff]  }
  0x23   :  { %v2500_v25 = vld [vmem:[#allocation5 + $0x334] ss:$24 sps:$4 sm:$0xff]   ;;  %v2503_v27 = vld [vmem:[#allocation5 + $0x330] ss:$24 sps:$4 sm:$0xff]   ;;  %v2504_v28 = vld [vmem:[#allocation5 + $0x4] ss:$24 sps:$4 sm:$0xff]  }
  0x24   :  { %1783 = vmatpush1.bf16.msra.mxu0 %v2478_v10  ;;  %v2506_v29 = vld [vmem:[#allocation5 + $0x304] ss:$24 sps:$4 sm:$0xff]   ;;  %v2508_v30 = vld [vmem:[#allocation5] ss:$24 sps:$4 sm:$0xff]   ;;  %v2510_v32 = vld [vmem:[#allocation5 + $0x2d4] ss:$24 sps:$4 sm:$0xff]  }
  0x25   :  { %1824 = vmatpush1.bf16.msra.mxu1 %v2479_v11  ;;  %1784 = vmatprep.subr.bf16.mxu0 %v2480_v12  ;;  %v2509_v31 = vld [vmem:[#allocation5 + $0x300] ss:$24 sps:$4 sm:$0xff]   ;;  %v2512_v33 = vld [vmem:[#allocation5 + $0x5d4] ss:$24 sps:$4 sm:$0xff]   ;;  %v2514_v34 = vld [vmem:[#allocation5 + $0x2d0] ss:$24 sps:$4 sm:$0xff]  }
  0x26   :  { %1825 = vmatprep.subr.bf16.mxu1 %v2482_v13  ;;  %v2515_v35 = vld [vmem:[#allocation5 + $0x5d0] ss:$24 sps:$4 sm:$0xff]   ;;  %v2516_v36 = vld [vmem:[#allocation5 + $0x2a4] ss:$24 sps:$4 sm:$0xff]   ;;  %v2520_v38 = vld [vmem:[#allocation5 + $0x2a0] ss:$24 sps:$4 sm:$0xff]  }
  0x27   :  { %v2518_v37 = vld [vmem:[#allocation5 + $0x5a4] ss:$24 sps:$4 sm:$0xff]   ;;  %v2521_v39 = vld [vmem:[#allocation5 + $0x5a0] ss:$24 sps:$4 sm:$0xff]   ;;  %v2522_v40 = vld [vmem:[#allocation5 + $0x274] ss:$24 sps:$4 sm:$0xff]  }
  0x28   :  { %1785 = vmatpush1.bf16.msra.mxu0 %v2484_v14  ;;  %v2524_v41 = vld [vmem:[#allocation5 + $0x574] ss:$24 sps:$4 sm:$0xff]   ;;  %v2526_v42 = vld [vmem:[#allocation5 + $0x270] ss:$24 sps:$4 sm:$0xff]   ;;  %v2528_v44 = vld [vmem:[#allocation5 + $0x244] ss:$24 sps:$4 sm:$0xff]  }
  0x29   :  { %1826 = vmatpush1.bf16.msra.mxu1 %v2485_v15  ;;  %1786 = vmatprep.subr.bf16.mxu0 %v2486_v16  ;;  %v2527_v43 = vld [vmem:[#allocation5 + $0x570] ss:$24 sps:$4 sm:$0xff]   ;;  %v2530_v45 = vld [vmem:[#allocation5 + $0x544] ss:$24 sps:$4 sm:$0xff]   ;;  %v2532_v47 = vld [vmem:[#allocation5 + $0x240] ss:$24 sps:$4 sm:$0xff]  }
  0x2a   :  { %1827 = vmatprep.subr.bf16.mxu1 %v2488_v17  ;;  %v327_v46 = vld [vmem:[#allocation2 + $0x8] sm:$0xff]  ;;  %v329_v50 = vld [vmem:[#allocation2 + $0x18] sm:$0xff]  ;;  %v326_v4 = vld [vmem:[#allocation2] sm:$0xff]  ;;  %s2964_s0 = smov [#allocation7]  }
  0x2b   :  { %v2533_v48 = vld [vmem:[#allocation5 + $0x540] ss:$24 sps:$4 sm:$0xff]   ;;  %v2986_v49 = vpack.c.bf16 %v327_v46, %v327_v46  ;;  %v2534_v51 = vld [vmem:[#allocation5 + $0x214] ss:$24 sps:$4 sm:$0xff]   ;;  %v2988_v52 = vpack.c.bf16 %v329_v50, %v329_v50  ;;  %v2538_v54 = vld [vmem:[#allocation5 + $0x210] ss:$24 sps:$4 sm:$0xff]   ;;  %v2992_v8 = vpack.c.bf16 %v326_v4, %v326_v4 }
  0x2c   :  { %1787 = vmatpush1.bf16.msra.mxu0 %v2490_v18  ;;  %v2536_v53 = vld [vmem:[#allocation5 + $0x514] ss:$24 sps:$4 sm:$0xff]   ;;  %v2539_v55 = vld [vmem:[#allocation5 + $0x510] ss:$24 sps:$4 sm:$0xff]   ;;  %v2540_v56 = vld [vmem:[#allocation5 + $0x1e4] ss:$24 sps:$4 sm:$0xff]  }
  0x2d   :  { %1828 = vmatpush1.bf16.msra.mxu1 %v2491_v19  ;;  %1788 = vmatprep.subr.bf16.mxu0 %v2492_v20  ;;  %v2542_v57 = vld [vmem:[#allocation5 + $0x4e4] ss:$24 sps:$4 sm:$0xff]   ;;  %v2544_v58 = vld [vmem:[#allocation5 + $0x1e0] ss:$24 sps:$4 sm:$0xff]   ;;  %v2546_v60 = vld [vmem:[#allocation5 + $0x1b4] ss:$24 sps:$4 sm:$0xff]  }
  0x2e   :  { %1829 = vmatprep.subr.bf16.mxu1 %v2494_v21  ;;  %1810 = vmatprep.mubr.bf16.mxu0 %v2986_v49  ;;  %v2545_v59 = vld [vmem:[#allocation5 + $0x4e0] ss:$24 sps:$4 sm:$0xff]   ;;  %v2548_v61 = vld [vmem:[#allocation5 + $0x4b4] ss:$24 sps:$4 sm:$0xff]   ;;  %v2550_v62 = vld [vmem:[#allocation5 + $0x1b0] ss:$24 sps:$4 sm:$0xff]  }
  0x2f   :  { %1851 = vmatprep.mubr.bf16.mxu1 %v2988_v52  ;;  %v2551_v63 = vld [vmem:[#allocation5 + $0x4b0] ss:$24 sps:$4 sm:$0xff]   ;;  %v2552_v0 = vld [vmem:[#allocation5 + $0x184] ss:$24 sps:$4 sm:$0xff]   ;;  %v2556_v2 = vld [vmem:[#allocation5 + $0x180] ss:$24 sps:$4 sm:$0xff]  }
  0x30   :  { %1789 = vmatpush1.bf16.msra.mxu0 %v2496_v22  ;;  %v2554_v1 = vld [vmem:[#allocation5 + $0x484] ss:$24 sps:$4 sm:$0xff]   ;;  %v2557_v3 = vld [vmem:[#allocation5 + $0x480] ss:$24 sps:$4 sm:$0xff]   ;;  %v2560_v6 = vld [vmem:[#allocation5 + $0x754] ss:$24 sps:$4 sm:$0xff]  }
  0x31   :  { %1830 = vmatpush1.bf16.msra.mxu1 %v2497_v23  ;;  %1790 = vmatprep.subr.bf16.mxu0 %v2498_v24  ;;  %v328_v5 = vld [vmem:[#allocation2 + $0x10] sm:$0xff]  ;;  %v2563_v7 = vld [vmem:[#allocation5 + $0x15c] ss:$24 sps:$4 sm:$0xff]   ;;  %v2558_v10 = vld [vmem:[#allocation5 + $0x750] ss:$24 sps:$4 sm:$0xff]   ;;  %s2159_s1 = sshll.u32 %s2964_s0, 4  ;;  %s2160_s1 = int_to_ptr.vmem [resolvable:$true] %s2159_s1 }
  0x32   :  { %1831 = vmatprep.subr.bf16.mxu1 %v2500_v25  ;;  %v2994_v9 = vpack.c.bf16 %v328_v5, %v328_v5  ;;  %v2561_v11 = vld [vmem:[#allocation5 + $0x158] ss:$24 sps:$4 sm:$0xff]   ;;  %v2566_v12 = vld [vmem:[#allocation5 + $0x724] ss:$24 sps:$4 sm:$0xff]   ;;  %v2567_v15 = vld [vmem:[#allocation5 + $0x128] ss:$24 sps:$4 sm:$0xff]   ;;  %p2939_p11 = scmp.lt.s32.totalorder %s2160_s1, %s2160_s1 }
  0x33   :  { %v2569_v13 = vld [vmem:[#allocation5 + $0x12c] ss:$24 sps:$4 sm:$0xff]   ;;  %v2564_v14 = vld [vmem:[#allocation5 + $0x720] ss:$24 sps:$4 sm:$0xff]   ;;  %v2575_v17 = vld [vmem:[#allocation5 + $0xfc] ss:$24 sps:$4 sm:$0xff]  }
  0x34   :  { %1791 = vmatpush1.bf16.msra.mxu0 %v2502_v26  ;;  %v2572_v16 = vld [vmem:[#allocation5 + $0x6f4] ss:$24 sps:$4 sm:$0xff]   ;;  %v2570_v18 = vld [vmem:[#allocation5 + $0x6f0] ss:$24 sps:$4 sm:$0xff]   ;;  %v2578_v20 = vld [vmem:[#allocation5 + $0x6c4] ss:$24 sps:$4 sm:$0xff]  }
  0x35   :  { %1832 = vmatpush1.bf16.msra.mxu1 %v2503_v27  ;;  %1792 = vmatprep.subr.bf16.mxu0 %v2504_v28  ;;  %v2573_v19 = vld [vmem:[#allocation5 + $0xf8] ss:$24 sps:$4 sm:$0xff]   ;;  %v2581_v21 = vld [vmem:[#allocation5 + $0xcc] ss:$24 sps:$4 sm:$0xff]   ;;  %v2579_v23 = vld [vmem:[#allocation5 + $0xc8] ss:$24 sps:$4 sm:$0xff]  }
  0x36   :  { %1833 = vmatprep.subr.bf16.mxu1 %v2506_v29  ;;  %v2576_v22 = vld [vmem:[#allocation5 + $0x6c0] ss:$24 sps:$4 sm:$0xff]   ;;  %v2584_v24 = vld [vmem:[#allocation5 + $0x694] ss:$24 sps:$4 sm:$0xff]   ;;  %v2582_v26 = vld [vmem:[#allocation5 + $0x690] ss:$24 sps:$4 sm:$0xff]  }
  0x37   :  { %v2587_v25 = vld [vmem:[#allocation5 + $0x9c] ss:$24 sps:$4 sm:$0xff]   ;;  %v2585_v27 = vld [vmem:[#allocation5 + $0x98] ss:$24 sps:$4 sm:$0xff]   ;;  %v2593_v29 = vld [vmem:[#allocation5 + $0x6c] ss:$24 sps:$4 sm:$0xff]  }
  0x38   :  { %1793 = vmatpush1.bf16.msra.mxu0 %v2508_v30  ;;  %v2590_v28 = vld [vmem:[#allocation5 + $0x664] ss:$24 sps:$4 sm:$0xff]   ;;  %v2588_v30 = vld [vmem:[#allocation5 + $0x660] ss:$24 sps:$4 sm:$0xff]   ;;  %v2644_v4 = vld [vmem:[#allocation5 + $0x7b4] ss:$24 sps:$4 sm:$0xff]  }
  0x39   :  { %1834 = vmatpush1.bf16.msra.mxu1 %v2509_v31  ;;  %1794 = vmatprep.subr.bf16.mxu0 %v2510_v32  ;;  %v2591_v31 = vld [vmem:[#allocation5 + $0x68] ss:$24 sps:$4 sm:$0xff]   ;;  %v2596_v32 = vld [vmem:[#allocation5 + $0x634] ss:$24 sps:$4 sm:$0xff]   ;;  %v2614_v46 = vld [vmem:[#allocation5 + $0x8a4] ss:$24 sps:$4 sm:$0xff]  }
  0x3a   :  { %1835 = vmatprep.subr.bf16.mxu1 %v2512_v33  ;;  %v2599_v33 = vld [vmem:[#allocation5 + $0x3c] ss:$24 sps:$4 sm:$0xff]   ;;  %v2615_v50 = vld [vmem:[#allocation5 + $0x2a8] ss:$24 sps:$4 sm:$0xff]   ;;  %s2934_s21 = scalar_lea.vmem %s2160_s1, 768 }
  0x3b   :  { %v2647_v5 = vld [vmem:[#allocation5 + $0x1bc] ss:$24 sps:$4 sm:$0xff]   ;;  %p2935_p10 = scmp.ne.s32.totalorder %s2160_s1, %s2934_s21  ;;  %p2940_p12 = scmp.lt.s32.totalorder %s2934_s21, %s2934_s21 }
  0x3c   :  { %1795 = vmatpush2.bf16.msra.mxu0 %v2514_v34  ;;  %v331_v34 = vld [vmem:[#allocation2 + $0x28] sm:$0xff] }
  0x3d   :  { %1836 = vmatpush2.bf16.msra.mxu1 %v2515_v35  ;;  %1796 = vmatprep.subr.bf16.mxu0 %v2516_v36  ;;  %v2999_v35 = vpack.c.bf16 %v331_v34, %v331_v34  ;;  %v2594_v36 = vld [vmem:[#allocation5 + $0x630] ss:$24 sps:$4 sm:$0xff]   ;;  %p2941_p13 = por %p2940_p12, %p2939_p11 }
  0x3e   :  { %1837 = vmatprep.subr.bf16.mxu1 %v2518_v37  ;;  %v2597_v37 = vld [vmem:[#allocation5 + $0x38] ss:$24 sps:$4 sm:$0xff]  }
  0x3f   :  { %v2678_v34 = vld [vmem:[#allocation5 + $0x398] ss:$24 sps:$4 sm:$0xff]   ;;  %p2942_p0 = pnand %p2941_p13, %p2935_p10 }
  0x40   :  { %1797 = vmatpush2.bf16.msra.mxu0 %v2520_v38  ;;  %v2602_v38 = vld [vmem:[#allocation5 + $0x604] ss:$24 sps:$4 sm:$0xff]  }
  0x41   :  { %1838 = vmatpush2.bf16.msra.mxu1 %v2521_v39  ;;  %1798 = vmatprep.subr.bf16.mxu0 %v2522_v40  ;;  %v2605_v39 = vld [vmem:[#allocation5 + $0xc] ss:$24 sps:$4 sm:$0xff]   ;;  %v2600_v40 = vld [vmem:[#allocation5 + $0x600] ss:$24 sps:$4 sm:$0xff]  }
  0x42   :  { %1839 = vmatprep.subr.bf16.mxu1 %v2524_v41  ;;  %v2603_v41 = vld [vmem:[#allocation5 + $0x8] ss:$24 sps:$4 sm:$0xff]  }
  0x44   :  { %1799 = vmatpush2.bf16.msra.mxu0 %v2526_v42  ;;  %v2608_v42 = vld [vmem:[#allocation5 + $0x8d4] ss:$24 sps:$4 sm:$0xff]  }
  0x45   :  { %1840 = vmatpush2.bf16.msra.mxu1 %v2527_v43  ;;  %1800 = vmatprep.subr.bf16.mxu0 %v2528_v44  ;;  %v2611_v43 = vld [vmem:[#allocation5 + $0x2dc] ss:$24 sps:$4 sm:$0xff]   ;;  %v2606_v44 = vld [vmem:[#allocation5 + $0x8d0] ss:$24 sps:$4 sm:$0xff]  }
  0x46   :  { %1841 = vmatprep.subr.bf16.mxu1 %v2530_v45  ;;  %v2609_v45 = vld [vmem:[#allocation5 + $0x2d8] ss:$24 sps:$4 sm:$0xff]  }
  0x48   :  { %1801 = vmatpush2.bf16.msra.mxu0 %v2532_v47  ;;  %v2617_v47 = vld [vmem:[#allocation5 + $0x2ac] ss:$24 sps:$4 sm:$0xff]  }
  0x49   :  { %1842 = vmatpush2.bf16.msra.mxu1 %v2533_v48  ;;  %1802 = vmatprep.subr.bf16.mxu0 %v2534_v51  ;;  %v2612_v48 = vld [vmem:[#allocation5 + $0x8a0] ss:$24 sps:$4 sm:$0xff]   ;;  %v2620_v51 = vld [vmem:[#allocation5 + $0x874] ss:$24 sps:$4 sm:$0xff]  }
  0x4a   :  { %1843 = vmatprep.subr.bf16.mxu1 %v2536_v53  ;;  %v2623_v53 = vld [vmem:[#allocation5 + $0x27c] ss:$24 sps:$4 sm:$0xff]  }
  0x4c   :  { %1803 = vmatpush2.bf16.msra.mxu0 %v2538_v54  ;;  %v2618_v54 = vld [vmem:[#allocation5 + $0x870] ss:$24 sps:$4 sm:$0xff]  }
  0x4d   :  { %1844 = vmatpush2.bf16.msra.mxu1 %v2539_v55  ;;  %1804 = vmatprep.subr.bf16.mxu0 %v2540_v56  ;;  %v2621_v55 = vld [vmem:[#allocation5 + $0x278] ss:$24 sps:$4 sm:$0xff]   ;;  %v2626_v56 = vld [vmem:[#allocation5 + $0x844] ss:$24 sps:$4 sm:$0xff]  }
  0x4e   :  { %1845 = vmatprep.subr.bf16.mxu1 %v2542_v57  ;;  %v2629_v57 = vld [vmem:[#allocation5 + $0x24c] ss:$24 sps:$4 sm:$0xff]  }
  0x50   :  { %1805 = vmatpush2.bf16.msra.mxu0 %v2544_v58  ;;  %v2624_v58 = vld [vmem:[#allocation5 + $0x840] ss:$24 sps:$4 sm:$0xff]  }
  0x51   :  { %1846 = vmatpush2.bf16.msra.mxu1 %v2545_v59  ;;  %1806 = vmatprep.subr.bf16.mxu0 %v2546_v60  ;;  %v2627_v59 = vld [vmem:[#allocation5 + $0x248] ss:$24 sps:$4 sm:$0xff]   ;;  %v2632_v60 = vld [vmem:[#allocation5 + $0x814] ss:$24 sps:$4 sm:$0xff]  }
  0x52   :  { %1847 = vmatprep.subr.bf16.mxu1 %v2548_v61  ;;  %v2635_v61 = vld [vmem:[#allocation5 + $0x21c] ss:$24 sps:$4 sm:$0xff]  }
  0x54   :  { %1807 = vmatpush2.bf16.msra.mxu0 %v2550_v62  ;;  %v2630_v62 = vld [vmem:[#allocation5 + $0x810] ss:$24 sps:$4 sm:$0xff]  }
  0x55   :  { %1848 = vmatpush2.bf16.msra.mxu1 %v2551_v63  ;;  %1808 = vmatprep.subr.bf16.mxu0 %v2552_v0  ;;  %v2633_v63 = vld [vmem:[#allocation5 + $0x218] ss:$24 sps:$4 sm:$0xff]   ;;  %v2638_v0 = vld [vmem:[#allocation5 + $0x7e4] ss:$24 sps:$4 sm:$0xff]  }
  0x56   :  { %1849 = vmatprep.subr.bf16.mxu1 %v2554_v1  ;;  %v2641_v1 = vld [vmem:[#allocation5 + $0x1ec] ss:$24 sps:$4 sm:$0xff]  }
  0x58   :  { %1809 = vmatpush2.bf16.msra.mxu0 %v2556_v2  ;;  %v2636_v2 = vld [vmem:[#allocation5 + $0x7e0] ss:$24 sps:$4 sm:$0xff]  }
  0x59   :  { %1850 = vmatpush2.bf16.msra.mxu1 %v2557_v3  ;;  %1860 = vmatprep.subr.bf16.mxu0 %v2560_v6  ;;  %v2639_v3 = vld [vmem:[#allocation5 + $0x1e8] ss:$24 sps:$4 sm:$0xff]  }
  0x5a   :  { %1901 = vmatprep.subr.bf16.mxu1 %v2563_v7  ;;  %v2642_v6 = vld [vmem:[#allocation5 + $0x7b0] ss:$24 sps:$4 sm:$0xff]  }
  0x5b   :  { %1811 = vmatmul.mubr.bf16.vlgmr.msra.gmra.mxu0 %v2992_v8  ;;  %v2645_v7 = vld [vmem:[#allocation5 + $0x1b8] ss:$24 sps:$4 sm:$0xff]  }
  0x5c   :  { %1852 = vmatmul.mubr.bf16.vlgmr.msra.gmra.mxu1 %v2994_v9  ;;  %1861 = vmatpush1.bf16.msra.mxu0 %v2558_v10  ;;  %v2650_v10 = vld [vmem:[#allocation5 + $0x784] ss:$24 sps:$4 sm:$0xff]  }
  0x5d   :  { %1902 = vmatpush1.bf16.msra.mxu1 %v2561_v11  ;;  %1862 = vmatprep.subr.bf16.mxu0 %v2566_v12  ;;  %v2653_v11 = vld [vmem:[#allocation5 + $0x18c] ss:$24 sps:$4 sm:$0xff]   ;;  %v2648_v12 = vld [vmem:[#allocation5 + $0x780] ss:$24 sps:$4 sm:$0xff]  }
  0x5e   :  { %1903 = vmatprep.subr.bf16.mxu1 %v2569_v13  ;;  %1933 = vmatprep.mubr.bf16.mxu1 %v2986_v49  ;;  %v2651_v13 = vld [vmem:[#allocation5 + $0x188] ss:$24 sps:$4 sm:$0xff]  }
  0x5f   :  { %1892 = vmatprep.mubr.bf16.mxu0 %v2999_v35 }
  0x60   :  { %1863 = vmatpush1.bf16.msra.mxu0 %v2564_v14  ;;  %v330_v14 = vld [vmem:[#allocation2 + $0x20] sm:$0xff] }
  0x61   :  { %1904 = vmatpush1.bf16.msra.mxu1 %v2567_v15  ;;  %1864 = vmatprep.subr.bf16.mxu0 %v2572_v16  ;;  %v2656_v15 = vld [vmem:[#allocation5 + $0x45c] ss:$24 sps:$4 sm:$0xff]  }
  0x62   :  { %1905 = vmatprep.subr.bf16.mxu1 %v2575_v17  ;;  %v2659_v16 = vld [vmem:[#allocation5 + $0x75c] ss:$24 sps:$4 sm:$0xff]   ;;  %v3002_v17 = vpack.c.bf16 %v330_v14, %v330_v14 }
  0x63   :  { %v2743_v14 = vld [vmem:[#allocation5 + $0x7bc] ss:$24 sps:$4 sm:$0xff]  }
  0x64   :  { %1865 = vmatpush1.bf16.msra.mxu0 %v2570_v18  ;;  %v2654_v18 = vld [vmem:[#allocation5 + $0x458] ss:$24 sps:$4 sm:$0xff]  }
  0x65   :  { %1906 = vmatpush1.bf16.msra.mxu1 %v2573_v19  ;;  %1866 = vmatprep.subr.bf16.mxu0 %v2578_v20  ;;  %v2657_v19 = vld [vmem:[#allocation5 + $0x758] ss:$24 sps:$4 sm:$0xff]   ;;  %v2662_v20 = vld [vmem:[#allocation5 + $0x42c] ss:$24 sps:$4 sm:$0xff]  }
  0x66   :  { %1907 = vmatprep.subr.bf16.mxu1 %v2581_v21  ;;  %v2665_v21 = vld [vmem:[#allocation5 + $0x72c] ss:$24 sps:$4 sm:$0xff]  }
  0x68   :  { %1867 = vmatpush1.bf16.msra.mxu0 %v2576_v22  ;;  %v2660_v22 = vld [vmem:[#allocation5 + $0x428] ss:$24 sps:$4 sm:$0xff]  }
  0x69   :  { %1908 = vmatpush1.bf16.msra.mxu1 %v2579_v23  ;;  %1868 = vmatprep.subr.bf16.mxu0 %v2584_v24  ;;  %v2663_v23 = vld [vmem:[#allocation5 + $0x728] ss:$24 sps:$4 sm:$0xff]   ;;  %v2668_v24 = vld [vmem:[#allocation5 + $0x3fc] ss:$24 sps:$4 sm:$0xff]  }
  0x6a   :  { %1909 = vmatprep.subr.bf16.mxu1 %v2587_v25  ;;  %v2671_v25 = vld [vmem:[#allocation5 + $0x6fc] ss:$24 sps:$4 sm:$0xff]  }
  0x6c   :  { %1869 = vmatpush1.bf16.msra.mxu0 %v2582_v26  ;;  %v2666_v26 = vld [vmem:[#allocation5 + $0x3f8] ss:$24 sps:$4 sm:$0xff]  }
  0x6d   :  { %1910 = vmatpush1.bf16.msra.mxu1 %v2585_v27  ;;  %1870 = vmatprep.subr.bf16.mxu0 %v2590_v28  ;;  %v2669_v27 = vld [vmem:[#allocation5 + $0x6f8] ss:$24 sps:$4 sm:$0xff]   ;;  %v2674_v28 = vld [vmem:[#allocation5 + $0x3cc] ss:$24 sps:$4 sm:$0xff]  }
  0x6e   :  { %1911 = vmatprep.subr.bf16.mxu1 %v2593_v29  ;;  %v2677_v29 = vld [vmem:[#allocation5 + $0x6cc] ss:$24 sps:$4 sm:$0xff]  }
  0x70   :  { %1871 = vmatpush1.bf16.msra.mxu0 %v2588_v30  ;;  %v2672_v30 = vld [vmem:[#allocation5 + $0x3c8] ss:$24 sps:$4 sm:$0xff]  }
  0x71   :  { %1912 = vmatpush1.bf16.msra.mxu1 %v2591_v31  ;;  %1872 = vmatprep.subr.bf16.mxu0 %v2596_v32  ;;  %v2675_v31 = vld [vmem:[#allocation5 + $0x6c8] ss:$24 sps:$4 sm:$0xff]   ;;  %v2680_v32 = vld [vmem:[#allocation5 + $0x39c] ss:$24 sps:$4 sm:$0xff]  }
  0x72   :  { %1913 = vmatprep.subr.bf16.mxu1 %v2599_v33  ;;  %v2683_v33 = vld [vmem:[#allocation5 + $0x69c] ss:$24 sps:$4 sm:$0xff]  }
  0x74   :  { %1873 = vmatpush1.bf16.msra.mxu0 %v2594_v36  ;;  %v2681_v36 = vld [vmem:[#allocation5 + $0x698] ss:$24 sps:$4 sm:$0xff]  }
  0x75   :  { %1914 = vmatpush1.bf16.msra.mxu1 %v2597_v37  ;;  %1874 = vmatprep.subr.bf16.mxu0 %v2602_v38  ;;  %v2686_v37 = vld [vmem:[#allocation5 + $0x36c] ss:$24 sps:$4 sm:$0xff]  }
  0x76   :  { %1915 = vmatprep.subr.bf16.mxu1 %v2605_v39  ;;  %v2689_v38 = vld [vmem:[#allocation5 + $0x66c] ss:$24 sps:$4 sm:$0xff]   ;;  %v2684_v39 = vld [vmem:[#allocation5 + $0x368] ss:$24 sps:$4 sm:$0xff]  }
  0x78   :  { %1875 = vmatpush1.bf16.msra.mxu0 %v2600_v40  ;;  %v2687_v40 = vld [vmem:[#allocation5 + $0x668] ss:$24 sps:$4 sm:$0xff]  }
  0x79   :  { %1916 = vmatpush1.bf16.msra.mxu1 %v2603_v41  ;;  %1876 = vmatprep.subr.bf16.mxu0 %v2608_v42  ;;  %v2692_v41 = vld [vmem:[#allocation5 + $0x33c] ss:$24 sps:$4 sm:$0xff]  }
  0x7a   :  { %1917 = vmatprep.subr.bf16.mxu1 %v2611_v43  ;;  %v2695_v42 = vld [vmem:[#allocation5 + $0x63c] ss:$24 sps:$4 sm:$0xff]   ;;  %v2690_v43 = vld [vmem:[#allocation5 + $0x338] ss:$24 sps:$4 sm:$0xff]  }
  0x7c   :  { %1877 = vmatpush2.bf16.msra.mxu0 %v2606_v44  ;;  %v2693_v44 = vld [vmem:[#allocation5 + $0x638] ss:$24 sps:$4 sm:$0xff]  }
  0x7d   :  { %1918 = vmatpush2.bf16.msra.mxu1 %v2609_v45  ;;  %1878 = vmatprep.subr.bf16.mxu0 %v2614_v46  ;;  %v2698_v45 = vld [vmem:[#allocation5 + $0x30c] ss:$24 sps:$4 sm:$0xff]  }
  0x7e   :  { %1919 = vmatprep.subr.bf16.mxu1 %v2617_v47  ;;  %v2701_v46 = vld [vmem:[#allocation5 + $0x60c] ss:$24 sps:$4 sm:$0xff]   ;;  %v2696_v47 = vld [vmem:[#allocation5 + $0x308] ss:$24 sps:$4 sm:$0xff]  }
  0x80   :  { %1879 = vmatpush2.bf16.msra.mxu0 %v2612_v48  ;;  %v2699_v48 = vld [vmem:[#allocation5 + $0x608] ss:$24 sps:$4 sm:$0xff]  }
  0x81   :  { %1920 = vmatpush2.bf16.msra.mxu1 %v2615_v50  ;;  %1880 = vmatprep.subr.bf16.mxu0 %v2620_v51  ;;  %v2704_v50 = vld [vmem:[#allocation5 + $0x5dc] ss:$24 sps:$4 sm:$0xff]  }
  0x82   :  { %1921 = vmatprep.subr.bf16.mxu1 %v2623_v53  ;;  %v2707_v51 = vld [vmem:[#allocation5 + $0x8dc] ss:$24 sps:$4 sm:$0xff]   ;;  %v2702_v53 = vld [vmem:[#allocation5 + $0x5d8] ss:$24 sps:$4 sm:$0xff]  }
  0x84   :  { %1881 = vmatpush2.bf16.msra.mxu0 %v2618_v54  ;;  %v2705_v54 = vld [vmem:[#allocation5 + $0x8d8] ss:$24 sps:$4 sm:$0xff]  }
  0x85   :  { %1922 = vmatpush2.bf16.msra.mxu1 %v2621_v55  ;;  %1882 = vmatprep.subr.bf16.mxu0 %v2626_v56  ;;  %v2710_v55 = vld [vmem:[#allocation5 + $0x5ac] ss:$24 sps:$4 sm:$0xff]  }
  0x86   :  { %1923 = vmatprep.subr.bf16.mxu1 %v2629_v57  ;;  %v2713_v56 = vld [vmem:[#allocation5 + $0x8ac] ss:$24 sps:$4 sm:$0xff]   ;;  %v2708_v57 = vld [vmem:[#allocation5 + $0x5a8] ss:$24 sps:$4 sm:$0xff]  }
  0x88   :  { %1883 = vmatpush2.bf16.msra.mxu0 %v2624_v58  ;;  %v2711_v58 = vld [vmem:[#allocation5 + $0x8a8] ss:$24 sps:$4 sm:$0xff]  }
  0x89   :  { %1924 = vmatpush2.bf16.msra.mxu1 %v2627_v59  ;;  %1884 = vmatprep.subr.bf16.mxu0 %v2632_v60  ;;  %v2716_v59 = vld [vmem:[#allocation5 + $0x57c] ss:$24 sps:$4 sm:$0xff]  }
  0x8a   :  { %1925 = vmatprep.subr.bf16.mxu1 %v2635_v61  ;;  %v2719_v60 = vld [vmem:[#allocation5 + $0x87c] ss:$24 sps:$4 sm:$0xff]   ;;  %v2714_v61 = vld [vmem:[#allocation5 + $0x578] ss:$24 sps:$4 sm:$0xff]  }
  0x8c   :  { %1885 = vmatpush2.bf16.msra.mxu0 %v2630_v62  ;;  %v2717_v62 = vld [vmem:[#allocation5 + $0x878] ss:$24 sps:$4 sm:$0xff]  }
  0x8d   :  { %1926 = vmatpush2.bf16.msra.mxu1 %v2633_v63  ;;  %1886 = vmatprep.subr.bf16.mxu0 %v2638_v0  ;;  %v2722_v63 = vld [vmem:[#allocation5 + $0x54c] ss:$24 sps:$4 sm:$0xff]  }
  0x8e   :  { %1927 = vmatprep.subr.bf16.mxu1 %v2641_v1  ;;  %v2725_v0 = vld [vmem:[#allocation5 + $0x84c] ss:$24 sps:$4 sm:$0xff]   ;;  %v2720_v1 = vld [vmem:[#allocation5 + $0x548] ss:$24 sps:$4 sm:$0xff]  }
  0x90   :  { %1887 = vmatpush2.bf16.msra.mxu0 %v2636_v2  ;;  %v2723_v2 = vld [vmem:[#allocation5 + $0x848] ss:$24 sps:$4 sm:$0xff]  }
  0x91   :  { %1928 = vmatpush2.bf16.msra.mxu1 %v2639_v3  ;;  %1888 = vmatprep.subr.bf16.mxu0 %v2644_v4  ;;  %v2728_v3 = vld [vmem:[#allocation5 + $0x51c] ss:$24 sps:$4 sm:$0xff]  }
  0x92   :  { %1929 = vmatprep.subr.bf16.mxu1 %v2647_v5  ;;  %v2731_v4 = vld [vmem:[#allocation5 + $0x81c] ss:$24 sps:$4 sm:$0xff]   ;;  %v2726_v5 = vld [vmem:[#allocation5 + $0x518] ss:$24 sps:$4 sm:$0xff]  }
  0x94   :  { %1889 = vmatpush2.bf16.msra.mxu0 %v2642_v6  ;;  %v2729_v6 = vld [vmem:[#allocation5 + $0x818] ss:$24 sps:$4 sm:$0xff]  }
  0x95   :  { %1930 = vmatpush2.bf16.msra.mxu1 %v2645_v7  ;;  %1890 = vmatprep.subr.bf16.mxu0 %v2650_v10  ;;  %v2734_v7 = vld [vmem:[#allocation5 + $0x4ec] ss:$24 sps:$4 sm:$0xff]  }
  0x96   :  { %1931 = vmatprep.subr.bf16.mxu1 %v2653_v11  ;;  %v2737_v10 = vld [vmem:[#allocation5 + $0x7ec] ss:$24 sps:$4 sm:$0xff]   ;;  %v2732_v11 = vld [vmem:[#allocation5 + $0x4e8] ss:$24 sps:$4 sm:$0xff]  }
  0x98   :  { %1891 = vmatpush2.bf16.msra.mxu0 %v2648_v12  ;;  %v2735_v12 = vld [vmem:[#allocation5 + $0x7e8] ss:$24 sps:$4 sm:$0xff]  }
  0x99   :  { %1932 = vmatpush2.bf16.msra.mxu1 %v2651_v13  ;;  %1942 = vmatprep.subr.bf16.mxu0 %v2656_v15  ;;  %v2740_v13 = vld [vmem:[#allocation5 + $0x4bc] ss:$24 sps:$4 sm:$0xff]   ;;  %v2738_v15 = vld [vmem:[#allocation5 + $0x4b8] ss:$24 sps:$4 sm:$0xff]  }
  0x9a   :  { %1983 = vmatprep.subr.bf16.mxu1 %v2659_v16  ;;  %v2741_v16 = vld [vmem:[#allocation5 + $0x7b8] ss:$24 sps:$4 sm:$0xff]  }
  0x9b   :  { %1893 = vmatmul.mubr.bf16.vlgmr.msra.gmra.mxu0 %v3002_v17 }
  0x9c   :  { %1934 = vmatmul.mubr.bf16.vlgmr.msra.gmra.mxu1 %v2992_v8  ;;  %1943 = vmatpush1.bf16.msra.mxu0 %v2654_v18  ;;  %v2746_v18 = vld [vmem:[#allocation5 + $0x48c] ss:$24 sps:$4 sm:$0xff]  }
  0x9d   :  { %1984 = vmatpush1.bf16.msra.mxu1 %v2657_v19  ;;  %1944 = vmatprep.subr.bf16.mxu0 %v2662_v20  ;;  %v2749_v19 = vld [vmem:[#allocation5 + $0x78c] ss:$24 sps:$4 sm:$0xff]   ;;  %v2744_v20 = vld [vmem:[#allocation5 + $0x488] ss:$24 sps:$4 sm:$0xff]  }
  0x9e   :  { %1985 = vmatprep.subr.bf16.mxu1 %v2665_v21  ;;  %1974 = vmatprep.mubr.bf16.mxu0 %v2988_v52  ;;  %v2747_v21 = vld [vmem:[#allocation5 + $0x788] ss:$24 sps:$4 sm:$0xff]  }
  0x9f   :  { %2015 = vmatprep.mubr.bf16.mxu1 %v2999_v35 }
  0xa0   :  { %1945 = vmatpush1.bf16.msra.mxu0 %v2660_v22  ;;  %v2752_v22 = vld [vmem:[#allocation5 + $0x164] ss:$24 sps:$4 sm:$0xff]  }
  0xa1   :  { %1986 = vmatpush1.bf16.msra.mxu1 %v2663_v23  ;;  %1946 = vmatprep.subr.bf16.mxu0 %v2668_v24  ;;  %v2755_v23 = vld [vmem:[#allocation5 + $0x464] ss:$24 sps:$4 sm:$0xff]   ;;  %v2750_v24 = vld [vmem:[#allocation5 + $0x160] ss:$24 sps:$4 sm:$0xff]  }
  0xa2   :  { %1987 = vmatprep.subr.bf16.mxu1 %v2671_v25  ;;  %v2753_v25 = vld [vmem:[#allocation5 + $0x460] ss:$24 sps:$4 sm:$0xff]  }
  0xa4   :  { %1947 = vmatpush1.bf16.msra.mxu0 %v2666_v26  ;;  %v2758_v26 = vld [vmem:[#allocation5 + $0x134] ss:$24 sps:$4 sm:$0xff]  }
  0xa5   :  { %1988 = vmatpush1.bf16.msra.mxu1 %v2669_v27  ;;  %1948 = vmatprep.subr.bf16.mxu0 %v2674_v28  ;;  %v2761_v27 = vld [vmem:[#allocation5 + $0x434] ss:$24 sps:$4 sm:$0xff]   ;;  %v2756_v28 = vld [vmem:[#allocation5 + $0x130] ss:$24 sps:$4 sm:$0xff]  }
  0xa6   :  { %1989 = vmatprep.subr.bf16.mxu1 %v2677_v29  ;;  %v2759_v29 = vld [vmem:[#allocation5 + $0x430] ss:$24 sps:$4 sm:$0xff]  }
  0xa8   :  { %1949 = vmatpush1.bf16.msra.mxu0 %v2672_v30  ;;  %v2764_v30 = vld [vmem:[#allocation5 + $0x104] ss:$24 sps:$4 sm:$0xff]  }
  0xa9   :  { %1990 = vmatpush1.bf16.msra.mxu1 %v2675_v31  ;;  %1950 = vmatprep.subr.bf16.mxu0 %v2680_v32  ;;  %v2767_v31 = vld [vmem:[#allocation5 + $0x404] ss:$24 sps:$4 sm:$0xff]   ;;  %v2762_v32 = vld [vmem:[#allocation5 + $0x100] ss:$24 sps:$4 sm:$0xff]  }
  0xaa   :  { %1991 = vmatprep.subr.bf16.mxu1 %v2683_v33  ;;  %v2765_v33 = vld [vmem:[#allocation5 + $0x400] ss:$24 sps:$4 sm:$0xff]  }
  0xac   :  { %1951 = vmatpush1.bf16.msra.mxu0 %v2678_v34  ;;  %v2770_v34 = vld [vmem:[#allocation5 + $0xd4] ss:$24 sps:$4 sm:$0xff]  }
  0xad   :  { %1992 = vmatpush1.bf16.msra.mxu1 %v2681_v36  ;;  %1952 = vmatprep.subr.bf16.mxu0 %v2686_v37  ;;  %v2773_v36 = vld [vmem:[#allocation5 + $0x3d4] ss:$24 sps:$4 sm:$0xff]   ;;  %v2768_v37 = vld [vmem:[#allocation5 + $0xd0] ss:$24 sps:$4 sm:$0xff]  }
  0xae   :  { %1993 = vmatprep.subr.bf16.mxu1 %v2689_v38  ;;  %v2771_v38 = vld [vmem:[#allocation5 + $0x3d0] ss:$24 sps:$4 sm:$0xff]  }
  0xb0   :  { %1953 = vmatpush1.bf16.msra.mxu0 %v2684_v39  ;;  %v2776_v39 = vld [vmem:[#allocation5 + $0xa4] ss:$24 sps:$4 sm:$0xff]  }
  0xb1   :  { %1994 = vmatpush1.bf16.msra.mxu1 %v2687_v40  ;;  %1954 = vmatprep.subr.bf16.mxu0 %v2692_v41  ;;  %v2779_v40 = vld [vmem:[#allocation5 + $0x3a4] ss:$24 sps:$4 sm:$0xff]   ;;  %v2782_v41 = vld [vmem:[#allocation5 + $0x74] ss:$24 sps:$4 sm:$0xff]  }
  0xb2   :  { %1995 = vmatprep.subr.bf16.mxu1 %v2695_v42  ;;  %v2785_v42 = vld [vmem:[#allocation5 + $0x374] ss:$24 sps:$4 sm:$0xff]  }
  0xb4   :  { %1955 = vmatpush1.bf16.msra.mxu0 %v2690_v43  ;;  %v2780_v43 = vld [vmem:[#allocation5 + $0x70] ss:$24 sps:$4 sm:$0xff]  }
  0xb5   :  { %1996 = vmatpush1.bf16.msra.mxu1 %v2693_v44  ;;  %1956 = vmatprep.subr.bf16.mxu0 %v2698_v45  ;;  %v2783_v44 = vld [vmem:[#allocation5 + $0x370] ss:$24 sps:$4 sm:$0xff]   ;;  %v2788_v45 = vld [vmem:[#allocation5 + $0x44] ss:$24 sps:$4 sm:$0xff]  }
  0xb6   :  { %1997 = vmatprep.subr.bf16.mxu1 %v2701_v46  ;;  %v2791_v46 = vld [vmem:[#allocation5 + $0x344] ss:$24 sps:$4 sm:$0xff]  }
  0xb8   :  { %1957 = vmatpush1.bf16.msra.mxu0 %v2696_v47  ;;  %v2786_v47 = vld [vmem:[#allocation5 + $0x40] ss:$24 sps:$4 sm:$0xff]  }
  0xb9   :  { %1998 = vmatpush1.bf16.msra.mxu1 %v2699_v48  ;;  %1958 = vmatprep.subr.bf16.mxu0 %v2704_v50  ;;  %v2789_v48 = vld [vmem:[#allocation5 + $0x340] ss:$24 sps:$4 sm:$0xff]   ;;  %v2794_v50 = vld [vmem:[#allocation5 + $0x14] ss:$24 sps:$4 sm:$0xff]  }
  0xba   :  { %1999 = vmatprep.subr.bf16.mxu1 %v2707_v51  ;;  %v2797_v51 = vld [vmem:[#allocation5 + $0x314] ss:$24 sps:$4 sm:$0xff]  }
  0xbc   :  { %1959 = vmatpush2.bf16.msra.mxu0 %v2702_v53  ;;  %v2792_v53 = vld [vmem:[#allocation5 + $0x10] ss:$24 sps:$4 sm:$0xff]  }
  0xbd   :  { %2000 = vmatpush2.bf16.msra.mxu1 %v2705_v54  ;;  %1960 = vmatprep.subr.bf16.mxu0 %v2710_v55  ;;  %v2795_v54 = vld [vmem:[#allocation5 + $0x310] ss:$24 sps:$4 sm:$0xff]   ;;  %v2800_v55 = vld [vmem:[#allocation5 + $0x2e4] ss:$24 sps:$4 sm:$0xff]  }
  0xbe   :  { %2001 = vmatprep.subr.bf16.mxu1 %v2713_v56  ;;  %v2803_v56 = vld [vmem:[#allocation5 + $0x5e4] ss:$24 sps:$4 sm:$0xff]  }
  0xc0   :  { %1961 = vmatpush2.bf16.msra.mxu0 %v2708_v57  ;;  %v2798_v57 = vld [vmem:[#allocation5 + $0x2e0] ss:$24 sps:$4 sm:$0xff]  }
  0xc1   :  { %2002 = vmatpush2.bf16.msra.mxu1 %v2711_v58  ;;  %1962 = vmatprep.subr.bf16.mxu0 %v2716_v59  ;;  %v2801_v58 = vld [vmem:[#allocation5 + $0x5e0] ss:$24 sps:$4 sm:$0xff]   ;;  %v2806_v59 = vld [vmem:[#allocation5 + $0x2b4] ss:$24 sps:$4 sm:$0xff]  }
  0xc2   :  { %2003 = vmatprep.subr.bf16.mxu1 %v2719_v60  ;;  %v2809_v60 = vld [vmem:[#allocation5 + $0x5b4] ss:$24 sps:$4 sm:$0xff]  }
  0xc4   :  { %1963 = vmatpush2.bf16.msra.mxu0 %v2714_v61  ;;  %v2804_v61 = vld [vmem:[#allocation5 + $0x2b0] ss:$24 sps:$4 sm:$0xff]  }
  0xc5   :  { %2004 = vmatpush2.bf16.msra.mxu1 %v2717_v62  ;;  %1964 = vmatprep.subr.bf16.mxu0 %v2722_v63  ;;  %v2807_v62 = vld [vmem:[#allocation5 + $0x5b0] ss:$24 sps:$4 sm:$0xff]   ;;  %v2812_v63 = vld [vmem:[#allocation5 + $0x284] ss:$24 sps:$4 sm:$0xff]  }
  0xc6   :  { %2005 = vmatprep.subr.bf16.mxu1 %v2725_v0  ;;  %v2815_v0 = vld [vmem:[#allocation5 + $0x584] ss:$24 sps:$4 sm:$0xff]  }
  0xc8   :  { %1965 = vmatpush2.bf16.msra.mxu0 %v2720_v1  ;;  %v2810_v1 = vld [vmem:[#allocation5 + $0x280] ss:$24 sps:$4 sm:$0xff]  }
  0xc9   :  { %2006 = vmatpush2.bf16.msra.mxu1 %v2723_v2  ;;  %1966 = vmatprep.subr.bf16.mxu0 %v2728_v3  ;;  %v2813_v2 = vld [vmem:[#allocation5 + $0x580] ss:$24 sps:$4 sm:$0xff]   ;;  %v2818_v3 = vld [vmem:[#allocation5 + $0x254] ss:$24 sps:$4 sm:$0xff]  }
  0xca   :  { %2007 = vmatprep.subr.bf16.mxu1 %v2731_v4  ;;  %v2821_v4 = vld [vmem:[#allocation5 + $0x554] ss:$24 sps:$4 sm:$0xff]  }
  0xcc   :  { %1967 = vmatpush2.bf16.msra.mxu0 %v2726_v5  ;;  %v2816_v5 = vld [vmem:[#allocation5 + $0x250] ss:$24 sps:$4 sm:$0xff]  }
  0xcd   :  { %2008 = vmatpush2.bf16.msra.mxu1 %v2729_v6  ;;  %1968 = vmatprep.subr.bf16.mxu0 %v2734_v7  ;;  %v2819_v6 = vld [vmem:[#allocation5 + $0x550] ss:$24 sps:$4 sm:$0xff]   ;;  %v2824_v7 = vld [vmem:[#allocation5 + $0x224] ss:$24 sps:$4 sm:$0xff]  }
  0xce   :  { %2009 = vmatprep.subr.bf16.mxu1 %v2737_v10  ;;  %v2827_v10 = vld [vmem:[#allocation5 + $0x524] ss:$24 sps:$4 sm:$0xff]  }
  0xd0   :  { %1969 = vmatpush2.bf16.msra.mxu0 %v2732_v11  ;;  %v2822_v11 = vld [vmem:[#allocation5 + $0x220] ss:$24 sps:$4 sm:$0xff]  }
  0xd1   :  { %2010 = vmatpush2.bf16.msra.mxu1 %v2735_v12  ;;  %1970 = vmatprep.subr.bf16.mxu0 %v2740_v13  ;;  %v2825_v12 = vld [vmem:[#allocation5 + $0x520] ss:$24 sps:$4 sm:$0xff]   ;;  %v2830_v13 = vld [vmem:[#allocation5 + $0x1f4] ss:$24 sps:$4 sm:$0xff]  }
  0xd2   :  { %2011 = vmatprep.subr.bf16.mxu1 %v2743_v14  ;;  %v2833_v14 = vld [vmem:[#allocation5 + $0x4f4] ss:$24 sps:$4 sm:$0xff]  }
  0xd4   :  { %1971 = vmatpush2.bf16.msra.mxu0 %v2738_v15  ;;  %v2828_v15 = vld [vmem:[#allocation5 + $0x1f0] ss:$24 sps:$4 sm:$0xff]  }
  0xd5   :  { %2012 = vmatpush2.bf16.msra.mxu1 %v2741_v16  ;;  %1972 = vmatprep.subr.bf16.mxu0 %v2746_v18  ;;  %v2831_v16 = vld [vmem:[#allocation5 + $0x4f0] ss:$24 sps:$4 sm:$0xff]   ;;  %v2836_v18 = vld [vmem:[#allocation5 + $0x1c4] ss:$24 sps:$4 sm:$0xff]  }
  0xd6   :  { %2013 = vmatprep.subr.bf16.mxu1 %v2749_v19  ;;  %v2839_v19 = vld [vmem:[#allocation5 + $0x4c4] ss:$24 sps:$4 sm:$0xff]  }
  0xd8   :  { %1973 = vmatpush2.bf16.msra.mxu0 %v2744_v20  ;;  %v2834_v20 = vld [vmem:[#allocation5 + $0x1c0] ss:$24 sps:$4 sm:$0xff]  }
  0xd9   :  { %2014 = vmatpush2.bf16.msra.mxu1 %v2747_v21  ;;  %2024 = vmatprep.subr.bf16.mxu0 %v2752_v22  ;;  %v2837_v21 = vld [vmem:[#allocation5 + $0x4c0] ss:$24 sps:$4 sm:$0xff]   ;;  %v2842_v22 = vld [vmem:[#allocation5 + $0x194] ss:$24 sps:$4 sm:$0xff]  }
  0xda   :  { %2065 = vmatprep.subr.bf16.mxu1 %v2755_v23  ;;  %v2845_v23 = vld [vmem:[#allocation5 + $0x494] ss:$24 sps:$4 sm:$0xff]  }
  0xdb   :  { %1975 = vmatmul.mubr.bf16.vlgmr.msra.gmra.mxu0 %v2994_v9 }
  0xdc   :  { %2016 = vmatmul.mubr.bf16.vlgmr.msra.gmra.mxu1 %v3002_v17  ;;  %2025 = vmatpush1.bf16.msra.mxu0 %v2750_v24  ;;  %v2840_v24 = vld [vmem:[#allocation5 + $0x190] ss:$24 sps:$4 sm:$0xff]  }
  0xdd   :  { %2066 = vmatpush1.bf16.msra.mxu1 %v2753_v25  ;;  %2026 = vmatprep.subr.bf16.mxu0 %v2758_v26  ;;  %v2843_v25 = vld [vmem:[#allocation5 + $0x490] ss:$24 sps:$4 sm:$0xff]   ;;  %v2848_v26 = vld [vmem:[#allocation5 + $0x764] ss:$24 sps:$4 sm:$0xff]  }
  0xde   :  { %2067 = vmatprep.subr.bf16.mxu1 %v2761_v27  ;;  %2056 = vmatprep.mubr.bf16.mxu0 %v2986_v49  ;;  %v2774_v49 = vld [vmem:[#allocation5 + $0xa0] ss:$24 sps:$4 sm:$0xff]  }
  0xdf   :  { %2097 = vmatprep.mubr.bf16.mxu1 %v2988_v52  ;;  %v2777_v52 = vld [vmem:[#allocation5 + $0x3a0] ss:$24 sps:$4 sm:$0xff]  }
  0xe0   :  { %2027 = vmatpush1.bf16.msra.mxu0 %v2756_v28  ;;  %v2846_v27 = vld [vmem:[#allocation5 + $0x760] ss:$24 sps:$4 sm:$0xff]   ;;  %v2851_v28 = vld [vmem:[#allocation5 + $0x734] ss:$24 sps:$4 sm:$0xff]  }
  0xe1   :  { %2068 = vmatpush1.bf16.msra.mxu1 %v2759_v29  ;;  %2028 = vmatprep.subr.bf16.mxu0 %v2764_v30 }
  0xe2   :  { %2069 = vmatprep.subr.bf16.mxu1 %v2767_v31  ;;  %v2849_v31 = vld [vmem:[#allocation5 + $0x730] ss:$24 sps:$4 sm:$0xff]  }
  0xe4   :  { %2029 = vmatpush1.bf16.msra.mxu0 %v2762_v32 }
  0xe5   :  { %2070 = vmatpush1.bf16.msra.mxu1 %v2765_v33  ;;  %2030 = vmatprep.subr.bf16.mxu0 %v2770_v34  ;;  %v2854_v34 = vld [vmem:[#allocation5 + $0x704] ss:$24 sps:$4 sm:$0xff]  }
  0xe6   :  { %2071 = vmatprep.subr.bf16.mxu1 %v2773_v36 }
  0xe8   :  { %2031 = vmatpush1.bf16.msra.mxu0 %v2768_v37 }
  0xe9   :  { %2072 = vmatpush1.bf16.msra.mxu1 %v2771_v38  ;;  %2032 = vmatprep.subr.bf16.mxu0 %v2776_v39  ;;  %v2852_v38 = vld [vmem:[#allocation5 + $0x700] ss:$24 sps:$4 sm:$0xff]  }
  0xea   :  { %2073 = vmatprep.subr.bf16.mxu1 %v2779_v40  ;;  %v2857_v40 = vld [vmem:[#allocation5 + $0x6d4] ss:$24 sps:$4 sm:$0xff]  }
  0xec   :  { %2033 = vmatpush1.bf16.msra.mxu0 %v2774_v49  ;;  %v2860_v49 = vld [vmem:[#allocation5 + $0x6a4] ss:$24 sps:$4 sm:$0xff]  }
  0xed   :  { %2074 = vmatpush1.bf16.msra.mxu1 %v2777_v52  ;;  %2034 = vmatprep.subr.bf16.mxu0 %v2782_v41  ;;  %v2863_v52 = vld [vmem:[#allocation5 + $0x674] ss:$24 sps:$4 sm:$0xff]   ;;  %v2861_v41 = vld [vmem:[#allocation5 + $0x670] ss:$24 sps:$4 sm:$0xff]  }
  0xee   :  { %2075 = vmatprep.subr.bf16.mxu1 %v2785_v42  ;;  %v2866_v42 = vld [vmem:[#allocation5 + $0x644] ss:$24 sps:$4 sm:$0xff]  }
  0xf0   :  { %2035 = vmatpush1.bf16.msra.mxu0 %v2780_v43  ;;  %v2864_v43 = vld [vmem:[#allocation5 + $0x640] ss:$24 sps:$4 sm:$0xff]  }
  0xf1   :  { %2076 = vmatpush1.bf16.msra.mxu1 %v2783_v44  ;;  %2036 = vmatprep.subr.bf16.mxu0 %v2788_v45  ;;  %v2869_v44 = vld [vmem:[#allocation5 + $0x614] ss:$24 sps:$4 sm:$0xff]   ;;  %v2867_v45 = vld [vmem:[#allocation5 + $0x610] ss:$24 sps:$4 sm:$0xff]  }
  0xf2   :  { %2077 = vmatprep.subr.bf16.mxu1 %v2791_v46  ;;  %v2872_v46 = vld [vmem:[#allocation5 + $0x8e4] ss:$24 sps:$4 sm:$0xff]  }
  0xf4   :  { %2037 = vmatpush1.bf16.msra.mxu0 %v2786_v47  ;;  %v2870_v47 = vld [vmem:[#allocation5 + $0x8e0] ss:$24 sps:$4 sm:$0xff]  }
  0xf5   :  { %2078 = vmatpush1.bf16.msra.mxu1 %v2789_v48  ;;  %2038 = vmatprep.subr.bf16.mxu0 %v2794_v50  ;;  %v2875_v48 = vld [vmem:[#allocation5 + $0x8b4] ss:$24 sps:$4 sm:$0xff]   ;;  %v2873_v50 = vld [vmem:[#allocation5 + $0x8b0] ss:$24 sps:$4 sm:$0xff]  }
  0xf6   :  { %2079 = vmatprep.subr.bf16.mxu1 %v2797_v51  ;;  %v2878_v51 = vld [vmem:[#allocation5 + $0x884] ss:$24 sps:$4 sm:$0xff]  }
  0xf8   :  { %2039 = vmatpush1.bf16.msra.mxu0 %v2792_v53  ;;  %v2876_v53 = vld [vmem:[#allocation5 + $0x880] ss:$24 sps:$4 sm:$0xff]  }
  0xf9   :  { %2080 = vmatpush1.bf16.msra.mxu1 %v2795_v54  ;;  %2040 = vmatprep.subr.bf16.mxu0 %v2800_v55  ;;  %v2881_v54 = vld [vmem:[#allocation5 + $0x854] ss:$24 sps:$4 sm:$0xff]   ;;  %v2879_v55 = vld [vmem:[#allocation5 + $0x850] ss:$24 sps:$4 sm:$0xff]  }
  0xfa   :  { %2081 = vmatprep.subr.bf16.mxu1 %v2803_v56  ;;  %v2884_v56 = vld [vmem:[#allocation5 + $0x824] ss:$24 sps:$4 sm:$0xff]  }
  0xfc   :  { %2041 = vmatpush2.bf16.msra.mxu0 %v2798_v57  ;;  %v2882_v57 = vld [vmem:[#allocation5 + $0x820] ss:$24 sps:$4 sm:$0xff]  }
  0xfd   :  { %2082 = vmatpush2.bf16.msra.mxu1 %v2801_v58  ;;  %2042 = vmatprep.subr.bf16.mxu0 %v2806_v59  ;;  %v2887_v58 = vld [vmem:[#allocation5 + $0x7f4] ss:$24 sps:$4 sm:$0xff]   ;;  %v2885_v59 = vld [vmem:[#allocation5 + $0x7f0] ss:$24 sps:$4 sm:$0xff]  }
  0xfe   :  { %2083 = vmatprep.subr.bf16.mxu1 %v2809_v60  ;;  %v2890_v60 = vld [vmem:[#allocation5 + $0x7c4] ss:$24 sps:$4 sm:$0xff]  }
 0x100   :  { %2043 = vmatpush2.bf16.msra.mxu0 %v2804_v61  ;;  %v2888_v61 = vld [vmem:[#allocation5 + $0x7c0] ss:$24 sps:$4 sm:$0xff]  }
 0x101   :  { %2084 = vmatpush2.bf16.msra.mxu1 %v2807_v62  ;;  %2044 = vmatprep.subr.bf16.mxu0 %v2812_v63  ;;  %v2893_v62 = vld [vmem:[#allocation5 + $0x794] ss:$24 sps:$4 sm:$0xff]   ;;  %v2891_v63 = vld [vmem:[#allocation5 + $0x790] ss:$24 sps:$4 sm:$0xff]  }
 0x102   :  { %2085 = vmatprep.subr.bf16.mxu1 %v2815_v0 }
 0x104   :  { %2045 = vmatpush2.bf16.msra.mxu0 %v2810_v1 }
 0x105   :  { %2086 = vmatpush2.bf16.msra.mxu1 %v2813_v2  ;;  %2046 = vmatprep.subr.bf16.mxu0 %v2818_v3 }
 0x106   :  { %2087 = vmatprep.subr.bf16.mxu1 %v2821_v4 }
 0x108   :  { %2047 = vmatpush2.bf16.msra.mxu0 %v2816_v5 }
 0x109   :  { %2088 = vmatpush2.bf16.msra.mxu1 %v2819_v6  ;;  %2048 = vmatprep.subr.bf16.mxu0 %v2824_v7 }
 0x10a   :  { %2089 = vmatprep.subr.bf16.mxu1 %v2827_v10 }
 0x10c   :  { %2049 = vmatpush2.bf16.msra.mxu0 %v2822_v11 }
 0x10d   :  { %2090 = vmatpush2.bf16.msra.mxu1 %v2825_v12  ;;  %2050 = vmatprep.subr.bf16.mxu0 %v2830_v13 }
 0x10e   :  { %2091 = vmatprep.subr.bf16.mxu1 %v2833_v14 }
 0x110   :  { %2051 = vmatpush2.bf16.msra.mxu0 %v2828_v15 }
 0x111   :  { %2092 = vmatpush2.bf16.msra.mxu1 %v2831_v16  ;;  %2052 = vmatprep.subr.bf16.mxu0 %v2836_v18 }
 0x112   :  { %2093 = vmatprep.subr.bf16.mxu1 %v2839_v19 }
 0x114   :  { %2053 = vmatpush2.bf16.msra.mxu0 %v2834_v20 }
 0x115   :  { %2094 = vmatpush2.bf16.msra.mxu1 %v2837_v21  ;;  %2054 = vmatprep.subr.bf16.mxu0 %v2842_v22 }
 0x116   :  { %2095 = vmatprep.subr.bf16.mxu1 %v2845_v23 }
 0x118   :  { %2055 = vmatpush2.bf16.msra.mxu0 %v2840_v24 }
 0x119   :  { %2096 = vmatpush2.bf16.msra.mxu1 %v2843_v25  ;;  %2106 = vmatprep.subr.bf16.mxu0 %v2848_v26 }
 0x11b   :  { %v3012_v29 = vpop.f32.mrf.mxu0  ;;  %2057 = vmatmul.mubr.bf16.vlgmr.msra.gmra.mxu0 %v2992_v8 }
 0x11c   :  { %v3014_v30 = vpop.f32.mrf.mxu1  ;;  %2098 = vmatmul.mubr.bf16.vlgmr.msra.gmra.mxu1 %v2994_v9  ;;  %2107 = vmatpush1.bf16.msra.mxu0 %v2846_v27  ;;  %v2855_v9 = vld [vmem:[#allocation5 + $0x6d0] ss:$24 sps:$4 sm:$0xff]  }
 0x11d   :  { %2138 = vmatprep.mubr.bf16.mxu0 %v2999_v35  ;;  %v3019_v32 = vpop.f32.mrf.mxu0  ;;  %2108 = vmatprep.subr.bf16.mxu0 %v2851_v28  ;;  %v2858_v35 = vld [vmem:[#allocation5 + $0x6a0] ss:$24 sps:$4 sm:$0xff]   ;;  %v1854_v0 = vadd.f32 %v3014_v30, %v3012_v29 }
 0x11e   :  { %v3021_v33 = vpop.f32.mrf.mxu1 }
 0x11f   :  { %v1816_v36 = vpop.f32.mrf.mxu0  ;;  %v1856_v3 = vadd.f32 %v3021_v33, %v3019_v32 }
 0x120   :  { %v1857_v37 = vpop.f32.mrf.mxu1  ;;  %2109 = vmatpush1.bf16.msra.mxu0 %v2849_v31 }
 0x121   :  { %v1817_v39 = vpop.f32.mrf.mxu0  ;;  %2110 = vmatprep.subr.bf16.mxu0 %v2854_v34 }
 0x122   :  { %v1858_v8 = vpop.f32.mrf.mxu1 }
 0x124   :  { %2111 = vmatpush1.bf16.msra.mxu0 %v2852_v38 }
 0x125   :  { %2112 = vmatprep.subr.bf16.mxu0 %v2857_v40 }
 0x128   :  { %2113 = vmatpush1.bf16.msra.mxu0 %v2855_v9 }
 0x129   :  { %2114 = vmatprep.subr.bf16.mxu0 %v2860_v49 }
 0x12c   :  { %2115 = vmatpush1.bf16.msra.mxu0 %v2858_v35 }
 0x12d   :  { %2116 = vmatprep.subr.bf16.mxu0 %v2863_v52 }
 0x130   :  { %2117 = vmatpush1.bf16.msra.mxu0 %v2861_v41 }
 0x131   :  { %2118 = vmatprep.subr.bf16.mxu0 %v2866_v42 }
 0x134   :  { %2119 = vmatpush1.bf16.msra.mxu0 %v2864_v43 }
 0x135   :  { %2120 = vmatprep.subr.bf16.mxu0 %v2869_v44 }
 0x138   :  { %2121 = vmatpush1.bf16.msra.mxu0 %v2867_v45 }
 0x139   :  { %2122 = vmatprep.subr.bf16.mxu0 %v2872_v46 }
 0x13c   :  { %2123 = vmatpush2.bf16.msra.mxu0 %v2870_v47 }
 0x13d   :  { %2124 = vmatprep.subr.bf16.mxu0 %v2875_v48 }
 0x140   :  { %2125 = vmatpush2.bf16.msra.mxu0 %v2873_v50 }
 0x141   :  { %2126 = vmatprep.subr.bf16.mxu0 %v2878_v51 }
 0x144   :  { %2127 = vmatpush2.bf16.msra.mxu0 %v2876_v53 }
 0x145   :  { %2128 = vmatprep.subr.bf16.mxu0 %v2881_v54 }
 0x148   :  { %2129 = vmatpush2.bf16.msra.mxu0 %v2879_v55 }
 0x149   :  { %2130 = vmatprep.subr.bf16.mxu0 %v2884_v56 }
 0x14c   :  { %2131 = vmatpush2.bf16.msra.mxu0 %v2882_v57 }
 0x14d   :  { %2132 = vmatprep.subr.bf16.mxu0 %v2887_v58 }
 0x150   :  { %2133 = vmatpush2.bf16.msra.mxu0 %v2885_v59 }
 0x151   :  { %2134 = vmatprep.subr.bf16.mxu0 %v2890_v60 }
 0x154   :  { %2135 = vmatpush2.bf16.msra.mxu0 %v2888_v61 }
 0x155   :  { %2136 = vmatprep.subr.bf16.mxu0 %v2893_v62 }
 0x158   :  { %2137 = vmatpush2.bf16.msra.mxu0 %v2891_v63 }
 0x15b   :  { %v1894_v1 = vpop.f32.mrf.mxu0  ;;  %2139 = vmatmul.mubr.bf16.vlgmr.msra.gmra.mxu0 %v3002_v17 }
 0x15c   :  { %v1935_v2 = vpop.f32.mrf.mxu1  ;;  %v1895_v4 = vadd.f32 %v1894_v1, %v1854_v0 }
 0x15d   :  { %v1896_v5 = vpop.f32.mrf.mxu0 }
 0x15e   :  { %v1937_v6 = vpop.f32.mrf.mxu1  ;;  %2147 = vst [vmem:[#allocation7] sm:$0xff] %v1895_v4  ;;  %v1897_v7 = vadd.f32 %v1896_v5, %v1856_v3 }
 0x15f   :  { %v1898_v10 = vpop.f32.mrf.mxu0 }
 0x160   :  { %v1939_v11 = vpop.f32.mrf.mxu1  ;;  %2148 = vst [vmem:[#allocation7 + $0x8] sm:$0xff] %v1897_v7 }
 0x161   :  { %v1899_v12 = vpop.f32.mrf.mxu0 }
 0x162   :  { %v1940_v13 = vpop.f32.mrf.mxu1 }
 0x19b   :  { %v1976_v14 = vpop.f32.mrf.mxu0 }
 0x19c   :  { %v2017_v15 = vpop.f32.mrf.mxu1  ;;  %v1977_v16 = vadd.f32 %v1976_v14, %v1935_v2 }
 0x19d   :  { %v1978_v18 = vpop.f32.mrf.mxu0 }
 0x19e   :  { %v2019_v19 = vpop.f32.mrf.mxu1  ;;  %v1979_v17 = vadd.f32 %v1978_v18, %v1937_v6  ;;  %v2018_v20 = vadd.f32 %v2017_v15, %v1977_v16 }
 0x19f   :  { %v1980_v21 = vpop.f32.mrf.mxu0 }
 0x1a0   :  { %v2021_v22 = vpop.f32.mrf.mxu1  ;;  %2149 = vst [vmem:[#allocation7 + $0x10] sm:$0xff] %v2018_v20  ;;  %v2020_v23 = vadd.f32 %v2019_v19, %v1979_v17 }
 0x1a1   :  { %v1981_v24 = vpop.f32.mrf.mxu0 }
 0x1a2   :  { %v2022_v25 = vpop.f32.mrf.mxu1  ;;  %2150 = vst [vmem:[#allocation7 + $0x18] sm:$0xff] %v2020_v23 }
 0x1db   :  { %v2058_v26 = vpop.f32.mrf.mxu0 }
 0x1dc   :  { %v2099_v27 = vpop.f32.mrf.mxu1 }
 0x1dd   :  { %v2060_v28 = vpop.f32.mrf.mxu0  ;;  %v2100_v34 = vadd.f32 %v2099_v27, %v2058_v26 }
 0x1de   :  { %v2101_v29 = vpop.f32.mrf.mxu1 }
 0x1df   :  { %v2062_v30 = vpop.f32.mrf.mxu0  ;;  %v2102_v37 = vadd.f32 %v2101_v29, %v2060_v28 }
 0x1e0   :  { %v2103_v31 = vpop.f32.mrf.mxu1 }
 0x1e1   :  { %v2063_v32 = vpop.f32.mrf.mxu0 }
 0x1e2   :  { %v2104_v33 = vpop.f32.mrf.mxu1 }
 0x21b   :  { %v2140_v36 = vpop.f32.mrf.mxu0 }
 0x21c   :  { %v2141_v38 = vadd.f32 %v2140_v36, %v2100_v34 }
 0x21d   :  { %v2142_v39 = vpop.f32.mrf.mxu0 }
 0x21e   :  { %2151 = vst [vmem:[#allocation7 + $0x20] sm:$0xff] %v2141_v38  ;;  %v2143_v40 = vadd.f32 %v2142_v39, %v2102_v37 }
 0x21f   :  { %v2144_v8 = vpop.f32.mrf.mxu0 }
 0x220   :  { %2152 = vst [vmem:[#allocation7 + $0x28] sm:$0xff] %v2143_v40 }
 0x221   :  { %v2145_v9 = vpop.f32.mrf.mxu0 }
 0x222   :  { %2945 = shalt.err (!%p2942_p0)
}
 0x223   :  { %2162 = dma.vmem_to_hbm [thread:$0]  %s2160_s1, 768, %s3033_s2, [#allocation4]  }
 0x224   :  { %2958 = dma.done.wait [#allocation4], 768  }
 0x225   :  { %2959 = vsyncadd [#allocation4], 4294966528 }
 0x226   :  { %2166 = vsyncpa [#allocation3], 1 }
 0x227   :  { %2167 = vsyncpa [#allocation6], 1 }
 0x228   :  { %2168 = vsyncpa [#allocation4], 1 }

// kernel: tpu_custom_call.1
= control target key start
LH: loop header
LB: loop body
LE: loop exit
PB: predicated region body
PF: predicated region fallthrough
CT: control target
= control target key end

     0   :  { %7 = vsyncpa [#allocation3], 0  ;;  %s3031_s0 = inlined_call_operand.hbm [shape: f32[8,768], index: 0, kind: input, shape index: {}]   ;;  %s3032_s1 = inlined_call_operand.hbm [shape: bf16[768,768], index: 1, kind: input, shape index: {}]   ;;  %s3033_s2 = inlined_call_operand.hbm [shape: f32[8,768], index: 2, kind: output, shape index: {}]  }
   0x1   :  { %8 = vsyncpa [#allocation6], 0 }
   0x2   :  { %9 = vsyncpa [#allocation4], 0  ;;  %s2960_s9 = smov [#allocation2]   ;;  %s2961_s11 = smov [#allocation5]  }
   0x3   :  { %s16_s10 = sshll.u32 %s2960_s9, 4  ;;  %s25_s12 = sshll.u32 %s2961_s11, 4  ;;  %s17_s10 = int_to_ptr.vmem [resolvable:$true] %s16_s10  ;;  %s26_s12 = int_to_ptr.vmem [resolvable:$true] %s25_s12 }
   0x4   :  { %s2902_s13 = scalar_lea.vmem %s17_s10, 768  ;;  %p2907_p1 = scmp.lt.s32.totalorder %s17_s10, %s17_s10 }
   0x5   :  { %p2903_p0 = scmp.ne.s32.totalorder %s17_s10, %s2902_s13  ;;  %p2908_p2 = scmp.lt.s32.totalorder %s2902_s13, %s2902_s13 }
   0x7   :  { %p2909_p3 = por %p2908_p2, %p2907_p1 }
   0x9   :  { %p2910_p4 = pnand %p2909_p3, %p2903_p0 }
   0xb   :  { %2913 = shalt.err (!%p2910_p4)
}
   0xc   :  { %19 = dma.hbm_to_vmem [thread:$0]  %s3031_s0, 768, %s17_s10, [#allocation3]  }
   0xd   :  { %s2922_s16 = scalar_lea.vmem %s26_s12, 36864  ;;  %p2927_p6 = scmp.lt.s32.totalorder %s26_s12, %s26_s12 }
   0xe   :  { %p2923_p5 = scmp.ne.s32.totalorder %s26_s12, %s2922_s16  ;;  %p2928_p7 = scmp.lt.s32.totalorder %s2922_s16, %s2922_s16 }
  0x10   :  { %p2929_p8 = por %p2928_p7, %p2927_p6 }
  0x12   :  { %p2930_p9 = pnand %p2929_p8, %p2923_p5 }
  0x14   :  { %2933 = shalt.err (!%p2930_p9)
}
  0x15   :  { %s2962_s17 = smov 384   ;;  %s2963_s18 = smov 24  }
  0x16   :  { %31 = dma.hbm_to_vmem [thread:$0]  %s3032_s1, 36864, %s26_s12, [#allocation6], %s2962_s17, %s2962_s17, %s2963_s18  }
  0x17   :  { %2954 = dma.done.wait [#allocation3], 768  }
  0x18   :  { %2955 = vsyncadd [#allocation3], 4294966528 }
  0x19   :  { %2956 = dma.done.wait [#allocation6], 36864  }
  0x1a   :  { %2957 = vsyncadd [#allocation6], 4294930432  ;;  %v2462_v0 = vld [vmem:[#allocation5 + $0x154] ss:$24 sps:$4 sm:$0xff]   ;;  %v2466_v2 = vld [vmem:[#allocation5 + $0x150] ss:$24 sps:$4 sm:$0xff]  }
  0x1b   :  { %v2464_v1 = vld [vmem:[#allocation5 + $0x454] ss:$24 sps:$4 sm:$0xff]   ;;  %1778 = vmatprep.subr.bf16.mxu0 %v2462_v0  ;;  %v2467_v3 = vld [vmem:[#allocation5 + $0x450] ss:$24 sps:$4 sm:$0xff]   ;;  %v2468_v4 = vld [vmem:[#allocation5 + $0x124] ss:$24 sps:$4 sm:$0xff]  }
  0x1c   :  { %1819 = vmatprep.subr.bf16.mxu1 %v2464_v1  ;;  %1779 = vmatpush1.bf16.msra.mxu0 %v2466_v2  ;;  %v2470_v5 = vld [vmem:[#allocation5 + $0x424] ss:$24 sps:$4 sm:$0xff]   ;;  %v2472_v6 = vld [vmem:[#allocation5 + $0x120] ss:$24 sps:$4 sm:$0xff]   ;;  %v2474_v8 = vld [vmem:[#allocation5 + $0xf4] ss:$24 sps:$4 sm:$0xff]  }
  0x1d   :  { %1820 = vmatpush1.bf16.msra.mxu1 %v2467_v3  ;;  %1780 = vmatprep.subr.bf16.mxu0 %v2468_v4  ;;  %v2473_v7 = vld [vmem:[#allocation5 + $0x420] ss:$24 sps:$4 sm:$0xff]   ;;  %v2476_v9 = vld [vmem:[#allocation5 + $0x3f4] ss:$24 sps:$4 sm:$0xff]   ;;  %v2478_v10 = vld [vmem:[#allocation5 + $0xf0] ss:$24 sps:$4 sm:$0xff]  }
  0x1e   :  { %1821 = vmatprep.subr.bf16.mxu1 %v2470_v5  ;;  %v2479_v11 = vld [vmem:[#allocation5 + $0x3f0] ss:$24 sps:$4 sm:$0xff]   ;;  %v2480_v12 = vld [vmem:[#allocation5 + $0xc4] ss:$24 sps:$4 sm:$0xff]   ;;  %v2484_v14 = vld [vmem:[#allocation5 + $0xc0] ss:$24 sps:$4 sm:$0xff]  }
  0x1f   :  { %v2482_v13 = vld [vmem:[#allocation5 + $0x3c4] ss:$24 sps:$4 sm:$0xff]   ;;  %v2485_v15 = vld [vmem:[#allocation5 + $0x3c0] ss:$24 sps:$4 sm:$0xff]   ;;  %v2486_v16 = vld [vmem:[#allocation5 + $0x94] ss:$24 sps:$4 sm:$0xff]  }
  0x20   :  { %1781 = vmatpush1.bf16.msra.mxu0 %v2472_v6  ;;  %v2488_v17 = vld [vmem:[#allocation5 + $0x394] ss:$24 sps:$4 sm:$0xff]   ;;  %v2490_v18 = vld [vmem:[#allocation5 + $0x90] ss:$24 sps:$4 sm:$0xff]   ;;  %v2492_v20 = vld [vmem:[#allocation5 + $0x64] ss:$24 sps:$4 sm:$0xff]  }
  0x21   :  { %1822 = vmatpush1.bf16.msra.mxu1 %v2473_v7  ;;  %1782 = vmatprep.subr.bf16.mxu0 %v2474_v8  ;;  %v2491_v19 = vld [vmem:[#allocation5 + $0x390] ss:$24 sps:$4 sm:$0xff]   ;;  %v2494_v21 = vld [vmem:[#allocation5 + $0x364] ss:$24 sps:$4 sm:$0xff]   ;;  %v2496_v22 = vld [vmem:[#allocation5 + $0x60] ss:$24 sps:$4 sm:$0xff]  }
  0x22   :  { %1823 = vmatprep.subr.bf16.mxu1 %v2476_v9  ;;  %v2497_v23 = vld [vmem:[#allocation5 + $0x360] ss:$24 sps:$4 sm:$0xff]   ;;  %v2498_v24 = vld [vmem:[#allocation5 + $0x34] ss:$24 sps:$4 sm:$0xff]   ;;  %v2502_v26 = vld [vmem:[#allocation5 + $0x30] ss:$24 sps:$4 sm:$0xff]  }
  0x23   :  { %v2500_v25 = vld [vmem:[#allocation5 + $0x334] ss:$24 sps:$4 sm:$0xff]   ;;  %v2503_v27 = vld [vmem:[#allocation5 + $0x330] ss:$24 sps:$4 sm:$0xff]   ;;  %v2504_v28 = vld [vmem:[#allocation5 + $0x4] ss:$24 sps:$4 sm:$0xff]  }
  0x24   :  { %1783 = vmatpush1.bf16.msra.mxu0 %v2478_v10  ;;  %v2506_v29 = vld [vmem:[#allocation5 + $0x304] ss:$24 sps:$4 sm:$0xff]   ;;  %v2508_v30 = vld [vmem:[#allocation5] ss:$24 sps:$4 sm:$0xff]   ;;  %v2510_v32 = vld [vmem:[#allocation5 + $0x2d4] ss:$24 sps:$4 sm:$0xff]  }
  0x25   :  { %1824 = vmatpush1.bf16.msra.mxu1 %v2479_v11  ;;  %1784 = vmatprep.subr.bf16.mxu0 %v2480_v12  ;;  %v2509_v31 = vld [vmem:[#allocation5 + $0x300] ss:$24 sps:$4 sm:$0xff]   ;;  %v2512_v33 = vld [vmem:[#allocation5 + $0x5d4] ss:$24 sps:$4 sm:$0xff]   ;;  %v2514_v34 = vld [vmem:[#allocation5 + $0x2d0] ss:$24 sps:$4 sm:$0xff]  }
  0x26   :  { %1825 = vmatprep.subr.bf16.mxu1 %v2482_v13  ;;  %v2515_v35 = vld [vmem:[#allocation5 + $0x5d0] ss:$24 sps:$4 sm:$0xff]   ;;  %v2516_v36 = vld [vmem:[#allocation5 + $0x2a4] ss:$24 sps:$4 sm:$0xff]   ;;  %v2520_v38 = vld [vmem:[#allocation5 + $0x2a0] ss:$24 sps:$4 sm:$0xff]  }
  0x27   :  { %v2518_v37 = vld [vmem:[#allocation5 + $0x5a4] ss:$24 sps:$4 sm:$0xff]   ;;  %v2521_v39 = vld [vmem:[#allocation5 + $0x5a0] ss:$24 sps:$4 sm:$0xff]   ;;  %v2522_v40 = vld [vmem:[#allocation5 + $0x274] ss:$24 sps:$4 sm:$0xff]  }
  0x28   :  { %1785 = vmatpush1.bf16.msra.mxu0 %v2484_v14  ;;  %v2524_v41 = vld [vmem:[#allocation5 + $0x574] ss:$24 sps:$4 sm:$0xff]   ;;  %v2526_v42 = vld [vmem:[#allocation5 + $0x270] ss:$24 sps:$4 sm:$0xff]   ;;  %v2528_v44 = vld [vmem:[#allocation5 + $0x244] ss:$24 sps:$4 sm:$0xff]  }
  0x29   :  { %1826 = vmatpush1.bf16.msra.mxu1 %v2485_v15  ;;  %1786 = vmatprep.subr.bf16.mxu0 %v2486_v16  ;;  %v2527_v43 = vld [vmem:[#allocation5 + $0x570] ss:$24 sps:$4 sm:$0xff]   ;;  %v2530_v45 = vld [vmem:[#allocation5 + $0x544] ss:$24 sps:$4 sm:$0xff]   ;;  %v2532_v47 = vld [vmem:[#allocation5 + $0x240] ss:$24 sps:$4 sm:$0xff]  }
  0x2a   :  { %1827 = vmatprep.subr.bf16.mxu1 %v2488_v17  ;;  %v327_v46 = vld [vmem:[#allocation2 + $0x8] sm:$0xff]  ;;  %v329_v50 = vld [vmem:[#allocation2 + $0x18] sm:$0xff]  ;;  %v326_v4 = vld [vmem:[#allocation2] sm:$0xff]  ;;  %s2964_s0 = smov [#allocation7]  }
  0x2b   :  { %v2533_v48 = vld [vmem:[#allocation5 + $0x540] ss:$24 sps:$4 sm:$0xff]   ;;  %v2986_v49 = vpack.c.bf16 %v327_v46, %v327_v46  ;;  %v2534_v51 = vld [vmem:[#allocation5 + $0x214] ss:$24 sps:$4 sm:$0xff]   ;;  %v2988_v52 = vpack.c.bf16 %v329_v50, %v329_v50  ;;  %v2538_v54 = vld [vmem:[#allocation5 + $0x210] ss:$24 sps:$4 sm:$0xff]   ;;  %v2992_v8 = vpack.c.bf16 %v326_v4, %v326_v4 }
  0x2c   :  { %1787 = vmatpush1.bf16.msra.mxu0 %v2490_v18  ;;  %v2536_v53 = vld [vmem:[#allocation5 + $0x514] ss:$24 sps:$4 sm:$0xff]   ;;  %v2539_v55 = vld [vmem:[#allocation5 + $0x510] ss:$24 sps:$4 sm:$0xff]   ;;  %v2540_v56 = vld [vmem:[#allocation5 + $0x1e4] ss:$24 sps:$4 sm:$0xff]  }
  0x2d   :  { %1828 = vmatpush1.bf16.msra.mxu1 %v2491_v19  ;;  %1788 = vmatprep.subr.bf16.mxu0 %v2492_v20  ;;  %v2542_v57 = vld [vmem:[#allocation5 + $0x4e4] ss:$24 sps:$4 sm:$0xff]   ;;  %v2544_v58 = vld [vmem:[#allocation5 + $0x1e0] ss:$24 sps:$4 sm:$0xff]   ;;  %v2546_v60 = vld [vmem:[#allocation5 + $0x1b4] ss:$24 sps:$4 sm:$0xff]  }
  0x2e   :  { %1829 = vmatprep.subr.bf16.mxu1 %v2494_v21  ;;  %1810 = vmatprep.mubr.bf16.mxu0 %v2986_v49  ;;  %v2545_v59 = vld [vmem:[#allocation5 + $0x4e0] ss:$24 sps:$4 sm:$0xff]   ;;  %v2548_v61 = vld [vmem:[#allocation5 + $0x4b4] ss:$24 sps:$4 sm:$0xff]   ;;  %v2550_v62 = vld [vmem:[#allocation5 + $0x1b0] ss:$24 sps:$4 sm:$0xff]  }
  0x2f   :  { %1851 = vmatprep.mubr.bf16.mxu1 %v2988_v52  ;;  %v2551_v63 = vld [vmem:[#allocation5 + $0x4b0] ss:$24 sps:$4 sm:$0xff]   ;;  %v2552_v0 = vld [vmem:[#allocation5 + $0x184] ss:$24 sps:$4 sm:$0xff]   ;;  %v2556_v2 = vld [vmem:[#allocation5 + $0x180] ss:$24 sps:$4 sm:$0xff]  }
  0x30   :  { %1789 = vmatpush1.bf16.msra.mxu0 %v2496_v22  ;;  %v2554_v1 = vld [vmem:[#allocation5 + $0x484] ss:$24 sps:$4 sm:$0xff]   ;;  %v2557_v3 = vld [vmem:[#allocation5 + $0x480] ss:$24 sps:$4 sm:$0xff]   ;;  %v2560_v6 = vld [vmem:[#allocation5 + $0x754] ss:$24 sps:$4 sm:$0xff]  }
  0x31   :  { %1830 = vmatpush1.bf16.msra.mxu1 %v2497_v23  ;;  %1790 = vmatprep.subr.bf16.mxu0 %v2498_v24  ;;  %v328_v5 = vld [vmem:[#allocation2 + $0x10] sm:$0xff]  ;;  %v2563_v7 = vld [vmem:[#allocation5 + $0x15c] ss:$24 sps:$4 sm:$0xff]   ;;  %v2558_v10 = vld [vmem:[#allocation5 + $0x750] ss:$24 sps:$4 sm:$0xff]   ;;  %s2159_s1 = sshll.u32 %s2964_s0, 4  ;;  %s2160_s1 = int_to_ptr.vmem [resolvable:$true] %s2159_s1 }
  0x32   :  { %1831 = vmatprep.subr.bf16.mxu1 %v2500_v25  ;;  %v2994_v9 = vpack.c.bf16 %v328_v5, %v328_v5  ;;  %v2561_v11 = vld [vmem:[#allocation5 + $0x158] ss:$24 sps:$4 sm:$0xff]   ;;  %v2566_v12 = vld [vmem:[#allocation5 + $0x724] ss:$24 sps:$4 sm:$0xff]   ;;  %v2567_v15 = vld [vmem:[#allocation5 + $0x128] ss:$24 sps:$4 sm:$0xff]   ;;  %p2939_p11 = scmp.lt.s32.totalorder %s2160_s1, %s2160_s1 }
  0x33   :  { %v2569_v13 = vld [vmem:[#allocation5 + $0x12c] ss:$24 sps:$4 sm:$0xff]   ;;  %v2564_v14 = vld [vmem:[#allocation5 + $0x720] ss:$24 sps:$4 sm:$0xff]   ;;  %v2575_v17 = vld [vmem:[#allocation5 + $0xfc] ss:$24 sps:$4 sm:$0xff]  }
  0x34   :  { %1791 = vmatpush1.bf16.msra.mxu0 %v2502_v26  ;;  %v2572_v16 = vld [vmem:[#allocation5 + $0x6f4] ss:$24 sps:$4 sm:$0xff]   ;;  %v2570_v18 = vld [vmem:[#allocation5 + $0x6f0] ss:$24 sps:$4 sm:$0xff]   ;;  %v2578_v20 = vld [vmem:[#allocation5 + $0x6c4] ss:$24 sps:$4 sm:$0xff]  }
  0x35   :  { %1832 = vmatpush1.bf16.msra.mxu1 %v2503_v27  ;;  %1792 = vmatprep.subr.bf16.mxu0 %v2504_v28  ;;  %v2573_v19 = vld [vmem:[#allocation5 + $0xf8] ss:$24 sps:$4 sm:$0xff]   ;;  %v2581_v21 = vld [vmem:[#allocation5 + $0xcc] ss:$24 sps:$4 sm:$0xff]   ;;  %v2579_v23 = vld [vmem:[#allocation5 + $0xc8] ss:$24 sps:$4 sm:$0xff]  }
  0x36   :  { %1833 = vmatprep.subr.bf16.mxu1 %v2506_v29  ;;  %v2576_v22 = vld [vmem:[#allocation5 + $0x6c0] ss:$24 sps:$4 sm:$0xff]   ;;  %v2584_v24 = vld [vmem:[#allocation5 + $0x694] ss:$24 sps:$4 sm:$0xff]   ;;  %v2582_v26 = vld [vmem:[#allocation5 + $0x690] ss:$24 sps:$4 sm:$0xff]  }
  0x37   :  { %v2587_v25 = vld [vmem:[#allocation5 + $0x9c] ss:$24 sps:$4 sm:$0xff]   ;;  %v2585_v27 = vld [vmem:[#allocation5 + $0x98] ss:$24 sps:$4 sm:$0xff]   ;;  %v2593_v29 = vld [vmem:[#allocation5 + $0x6c] ss:$24 sps:$4 sm:$0xff]  }
  0x38   :  { %1793 = vmatpush1.bf16.msra.mxu0 %v2508_v30  ;;  %v2590_v28 = vld [vmem:[#allocation5 + $0x664] ss:$24 sps:$4 sm:$0xff]   ;;  %v2588_v30 = vld [vmem:[#allocation5 + $0x660] ss:$24 sps:$4 sm:$0xff]   ;;  %v2644_v4 = vld [vmem:[#allocation5 + $0x7b4] ss:$24 sps:$4 sm:$0xff]  }
  0x39   :  { %1834 = vmatpush1.bf16.msra.mxu1 %v2509_v31  ;;  %1794 = vmatprep.subr.bf16.mxu0 %v2510_v32  ;;  %v2591_v31 = vld [vmem:[#allocation5 + $0x68] ss:$24 sps:$4 sm:$0xff]   ;;  %v2596_v32 = vld [vmem:[#allocation5 + $0x634] ss:$24 sps:$4 sm:$0xff]   ;;  %v2614_v46 = vld [vmem:[#allocation5 + $0x8a4] ss:$24 sps:$4 sm:$0xff]  }
  0x3a   :  { %1835 = vmatprep.subr.bf16.mxu1 %v2512_v33  ;;  %v2599_v33 = vld [vmem:[#allocation5 + $0x3c] ss:$24 sps:$4 sm:$0xff]   ;;  %v2615_v50 = vld [vmem:[#allocation5 + $0x2a8] ss:$24 sps:$4 sm:$0xff]   ;;  %s2934_s21 = scalar_lea.vmem %s2160_s1, 768 }
  0x3b   :  { %v2647_v5 = vld [vmem:[#allocation5 + $0x1bc] ss:$24 sps:$4 sm:$0xff]   ;;  %p2935_p10 = scmp.ne.s32.totalorder %s2160_s1, %s2934_s21  ;;  %p2940_p12 = scmp.lt.s32.totalorder %s2934_s21, %s2934_s21 }
  0x3c   :  { %1795 = vmatpush2.bf16.msra.mxu0 %v2514_v34  ;;  %v331_v34 = vld [vmem:[#allocation2 + $0x28] sm:$0xff] }
  0x3d   :  { %1836 = vmatpush2.bf16.msra.mxu1 %v2515_v35  ;;  %1796 = vmatprep.subr.bf16.mxu0 %v2516_v36  ;;  %v2999_v35 = vpack.c.bf16 %v331_v34, %v331_v34  ;;  %v2594_v36 = vld [vmem:[#allocation5 + $0x630] ss:$24 sps:$4 sm:$0xff]   ;;  %p2941_p13 = por %p2940_p12, %p2939_p11 }
  0x3e   :  { %1837 = vmatprep.subr.bf16.mxu1 %v2518_v37  ;;  %v2597_v37 = vld [vmem:[#allocation5 + $0x38] ss:$24 sps:$4 sm:$0xff]  }
  0x3f   :  { %v2678_v34 = vld [vmem:[#allocation5 + $0x398] ss:$24 sps:$4 sm:$0xff]   ;;  %p2942_p0 = pnand %p2941_p13, %p2935_p10 }
  0x40   :  { %1797 = vmatpush2.bf16.msra.mxu0 %v2520_v38  ;;  %v2602_v38 = vld [vmem:[#allocation5 + $0x604] ss:$24 sps:$4 sm:$0xff]  }
  0x41   :  { %1838 = vmatpush2.bf16.msra.mxu1 %v2521_v39  ;;  %1798 = vmatprep.subr.bf16.mxu0 %v2522_v40  ;;  %v2605_v39 = vld [vmem:[#allocation5 + $0xc] ss:$24 sps:$4 sm:$0xff]   ;;  %v2600_v40 = vld [vmem:[#allocation5 + $0x600] ss:$24 sps:$4 sm:$0xff]  }
  0x42   :  { %1839 = vmatprep.subr.bf16.mxu1 %v2524_v41  ;;  %v2603_v41 = vld [vmem:[#allocation5 + $0x8] ss:$24 sps:$4 sm:$0xff]  }
  0x44   :  { %1799 = vmatpush2.bf16.msra.mxu0 %v2526_v42  ;;  %v2608_v42 = vld [vmem:[#allocation5 + $0x8d4] ss:$24 sps:$4 sm:$0xff]  }
  0x45   :  { %1840 = vmatpush2.bf16.msra.mxu1 %v2527_v43  ;;  %1800 = vmatprep.subr.bf16.mxu0 %v2528_v44  ;;  %v2611_v43 = vld [vmem:[#allocation5 + $0x2dc] ss:$24 sps:$4 sm:$0xff]   ;;  %v2606_v44 = vld [vmem:[#allocation5 + $0x8d0] ss:$24 sps:$4 sm:$0xff]  }
  0x46   :  { %1841 = vmatprep.subr.bf16.mxu1 %v2530_v45  ;;  %v2609_v45 = vld [vmem:[#allocation5 + $0x2d8] ss:$24 sps:$4 sm:$0xff]  }
  0x48   :  { %1801 = vmatpush2.bf16.msra.mxu0 %v2532_v47  ;;  %v2617_v47 = vld [vmem:[#allocation5 + $0x2ac] ss:$24 sps:$4 sm:$0xff]  }
  0x49   :  { %1842 = vmatpush2.bf16.msra.mxu1 %v2533_v48  ;;  %1802 = vmatprep.subr.bf16.mxu0 %v2534_v51  ;;  %v2612_v48 = vld [vmem:[#allocation5 + $0x8a0] ss:$24 sps:$4 sm:$0xff]   ;;  %v2620_v51 = vld [vmem:[#allocation5 + $0x874] ss:$24 sps:$4 sm:$0xff]  }
  0x4a   :  { %1843 = vmatprep.subr.bf16.mxu1 %v2536_v53  ;;  %v2623_v53 = vld [vmem:[#allocation5 + $0x27c] ss:$24 sps:$4 sm:$0xff]  }
  0x4c   :  { %1803 = vmatpush2.bf16.msra.mxu0 %v2538_v54  ;;  %v2618_v54 = vld [vmem:[#allocation5 + $0x870] ss:$24 sps:$4 sm:$0xff]  }
  0x4d   :  { %1844 = vmatpush2.bf16.msra.mxu1 %v2539_v55  ;;  %1804 = vmatprep.subr.bf16.mxu0 %v2540_v56  ;;  %v2621_v55 = vld [vmem:[#allocation5 + $0x278] ss:$24 sps:$4 sm:$0xff]   ;;  %v2626_v56 = vld [vmem:[#allocation5 + $0x844] ss:$24 sps:$4 sm:$0xff]  }
  0x4e   :  { %1845 = vmatprep.subr.bf16.mxu1 %v2542_v57  ;;  %v2629_v57 = vld [vmem:[#allocation5 + $0x24c] ss:$24 sps:$4 sm:$0xff]  }
  0x50   :  { %1805 = vmatpush2.bf16.msra.mxu0 %v2544_v58  ;;  %v2624_v58 = vld [vmem:[#allocation5 + $0x840] ss:$24 sps:$4 sm:$0xff]  }
  0x51   :  { %1846 = vmatpush2.bf16.msra.mxu1 %v2545_v59  ;;  %1806 = vmatprep.subr.bf16.mxu0 %v2546_v60  ;;  %v2627_v59 = vld [vmem:[#allocation5 + $0x248] ss:$24 sps:$4 sm:$0xff]   ;;  %v2632_v60 = vld [vmem:[#allocation5 + $0x814] ss:$24 sps:$4 sm:$0xff]  }
  0x52   :  { %1847 = vmatprep.subr.bf16.mxu1 %v2548_v61  ;;  %v2635_v61 = vld [vmem:[#allocation5 + $0x21c] ss:$24 sps:$4 sm:$0xff]  }
  0x54   :  { %1807 = vmatpush2.bf16.msra.mxu0 %v2550_v62  ;;  %v2630_v62 = vld [vmem:[#allocation5 + $0x810] ss:$24 sps:$4 sm:$0xff]  }
  0x55   :  { %1848 = vmatpush2.bf16.msra.mxu1 %v2551_v63  ;;  %1808 = vmatprep.subr.bf16.mxu0 %v2552_v0  ;;  %v2633_v63 = vld [vmem:[#allocation5 + $0x218] ss:$24 sps:$4 sm:$0xff]   ;;  %v2638_v0 = vld [vmem:[#allocation5 + $0x7e4] ss:$24 sps:$4 sm:$0xff]  }
  0x56   :  { %1849 = vmatprep.subr.bf16.mxu1 %v2554_v1  ;;  %v2641_v1 = vld [vmem:[#allocation5 + $0x1ec] ss:$24 sps:$4 sm:$0xff]  }
  0x58   :  { %1809 = vmatpush2.bf16.msra.mxu0 %v2556_v2  ;;  %v2636_v2 = vld [vmem:[#allocation5 + $0x7e0] ss:$24 sps:$4 sm:$0xff]  }
  0x59   :  { %1850 = vmatpush2.bf16.msra.mxu1 %v2557_v3  ;;  %1860 = vmatprep.subr.bf16.mxu0 %v2560_v6  ;;  %v2639_v3 = vld [vmem:[#allocation5 + $0x1e8] ss:$24 sps:$4 sm:$0xff]  }
  0x5a   :  { %1901 = vmatprep.subr.bf16.mxu1 %v2563_v7  ;;  %v2642_v6 = vld [vmem:[#allocation5 + $0x7b0] ss:$24 sps:$4 sm:$0xff]  }
  0x5b   :  { %1811 = vmatmul.mubr.bf16.vlgmr.msra.gmra.mxu0 %v2992_v8  ;;  %v2645_v7 = vld [vmem:[#allocation5 + $0x1b8] ss:$24 sps:$4 sm:$0xff]  }
  0x5c   :  { %1852 = vmatmul.mubr.bf16.vlgmr.msra.gmra.mxu1 %v2994_v9  ;;  %1861 = vmatpush1.bf16.msra.mxu0 %v2558_v10  ;;  %v2650_v10 = vld [vmem:[#allocation5 + $0x784] ss:$24 sps:$4 sm:$0xff]  }
  0x5d   :  { %1902 = vmatpush1.bf16.msra.mxu1 %v2561_v11  ;;  %1862 = vmatprep.subr.bf16.mxu0 %v2566_v12  ;;  %v2653_v11 = vld [vmem:[#allocation5 + $0x18c] ss:$24 sps:$4 sm:$0xff]   ;;  %v2648_v12 = vld [vmem:[#allocation5 + $0x780] ss:$24 sps:$4 sm:$0xff]  }
  0x5e   :  { %1903 = vmatprep.subr.bf16.mxu1 %v2569_v13  ;;  %1933 = vmatprep.mubr.bf16.mxu1 %v2986_v49  ;;  %v2651_v13 = vld [vmem:[#allocation5 + $0x188] ss:$24 sps:$4 sm:$0xff]  }
  0x5f   :  { %1892 = vmatprep.mubr.bf16.mxu0 %v2999_v35 }
  0x60   :  { %1863 = vmatpush1.bf16.msra.mxu0 %v2564_v14  ;;  %v330_v14 = vld [vmem:[#allocation2 + $0x20] sm:$0xff] }
  0x61   :  { %1904 = vmatpush1.bf16.msra.mxu1 %v2567_v15  ;;  %1864 = vmatprep.subr.bf16.mxu0 %v2572_v16  ;;  %v2656_v15 = vld [vmem:[#allocation5 + $0x45c] ss:$24 sps:$4 sm:$0xff]  }
  0x62   :  { %1905 = vmatprep.subr.bf16.mxu1 %v2575_v17  ;;  %v2659_v16 = vld [vmem:[#allocation5 + $0x75c] ss:$24 sps:$4 sm:$0xff]   ;;  %v3002_v17 = vpack.c.bf16 %v330_v14, %v330_v14 }
  0x63   :  { %v2743_v14 = vld [vmem:[#allocation5 + $0x7bc] ss:$24 sps:$4 sm:$0xff]  }
  0x64   :  { %1865 = vmatpush1.bf16.msra.mxu0 %v2570_v18  ;;  %v2654_v18 = vld [vmem:[#allocation5 + $0x458] ss:$24 sps:$4 sm:$0xff]  }
  0x65   :  { %1906 = vmatpush1.bf16.msra.mxu1 %v2573_v19  ;;  %1866 = vmatprep.subr.bf16.mxu0 %v2578_v20  ;;  %v2657_v19 = vld [vmem:[#allocation5 + $0x758] ss:$24 sps:$4 sm:$0xff]   ;;  %v2662_v20 = vld [vmem:[#allocation5 + $0x42c] ss:$24 sps:$4 sm:$0xff]  }
  0x66   :  { %1907 = vmatprep.subr.bf16.mxu1 %v2581_v21  ;;  %v2665_v21 = vld [vmem:[#allocation5 + $0x72c] ss:$24 sps:$4 sm:$0xff]  }
  0x68   :  { %1867 = vmatpush1.bf16.msra.mxu0 %v2576_v22  ;;  %v2660_v22 = vld [vmem:[#allocation5 + $0x428] ss:$24 sps:$4 sm:$0xff]  }
  0x69   :  { %1908 = vmatpush1.bf16.msra.mxu1 %v2579_v23  ;;  %1868 = vmatprep.subr.bf16.mxu0 %v2584_v24  ;;  %v2663_v23 = vld [vmem:[#allocation5 + $0x728] ss:$24 sps:$4 sm:$0xff]   ;;  %v2668_v24 = vld [vmem:[#allocation5 + $0x3fc] ss:$24 sps:$4 sm:$0xff]  }
  0x6a   :  { %1909 = vmatprep.subr.bf16.mxu1 %v2587_v25  ;;  %v2671_v25 = vld [vmem:[#allocation5 + $0x6fc] ss:$24 sps:$4 sm:$0xff]  }
  0x6c   :  { %1869 = vmatpush1.bf16.msra.mxu0 %v2582_v26  ;;  %v2666_v26 = vld [vmem:[#allocation5 + $0x3f8] ss:$24 sps:$4 sm:$0xff]  }
  0x6d   :  { %1910 = vmatpush1.bf16.msra.mxu1 %v2585_v27  ;;  %1870 = vmatprep.subr.bf16.mxu0 %v2590_v28  ;;  %v2669_v27 = vld [vmem:[#allocation5 + $0x6f8] ss:$24 sps:$4 sm:$0xff]   ;;  %v2674_v28 = vld [vmem:[#allocation5 + $0x3cc] ss:$24 sps:$4 sm:$0xff]  }
  0x6e   :  { %1911 = vmatprep.subr.bf16.mxu1 %v2593_v29  ;;  %v2677_v29 = vld [vmem:[#allocation5 + $0x6cc] ss:$24 sps:$4 sm:$0xff]  }
  0x70   :  { %1871 = vmatpush1.bf16.msra.mxu0 %v2588_v30  ;;  %v2672_v30 = vld [vmem:[#allocation5 + $0x3c8] ss:$24 sps:$4 sm:$0xff]  }
  0x71   :  { %1912 = vmatpush1.bf16.msra.mxu1 %v2591_v31  ;;  %1872 = vmatprep.subr.bf16.mxu0 %v2596_v32  ;;  %v2675_v31 = vld [vmem:[#allocation5 + $0x6c8] ss:$24 sps:$4 sm:$0xff]   ;;  %v2680_v32 = vld [vmem:[#allocation5 + $0x39c] ss:$24 sps:$4 sm:$0xff]  }
  0x72   :  { %1913 = vmatprep.subr.bf16.mxu1 %v2599_v33  ;;  %v2683_v33 = vld [vmem:[#allocation5 + $0x69c] ss:$24 sps:$4 sm:$0xff]  }
  0x74   :  { %1873 = vmatpush1.bf16.msra.mxu0 %v2594_v36  ;;  %v2681_v36 = vld [vmem:[#allocation5 + $0x698] ss:$24 sps:$4 sm:$0xff]  }
  0x75   :  { %1914 = vmatpush1.bf16.msra.mxu1 %v2597_v37  ;;  %1874 = vmatprep.subr.bf16.mxu0 %v2602_v38  ;;  %v2686_v37 = vld [vmem:[#allocation5 + $0x36c] ss:$24 sps:$4 sm:$0xff]  }
  0x76   :  { %1915 = vmatprep.subr.bf16.mxu1 %v2605_v39  ;;  %v2689_v38 = vld [vmem:[#allocation5 + $0x66c] ss:$24 sps:$4 sm:$0xff]   ;;  %v2684_v39 = vld [vmem:[#allocation5 + $0x368] ss:$24 sps:$4 sm:$0xff]  }
  0x78   :  { %1875 = vmatpush1.bf16.msra.mxu0 %v2600_v40  ;;  %v2687_v40 = vld [vmem:[#allocation5 + $0x668] ss:$24 sps:$4 sm:$0xff]  }
  0x79   :  { %1916 = vmatpush1.bf16.msra.mxu1 %v2603_v41  ;;  %1876 = vmatprep.subr.bf16.mxu0 %v2608_v42  ;;  %v2692_v41 = vld [vmem:[#allocation5 + $0x33c] ss:$24 sps:$4 sm:$0xff]  }
  0x7a   :  { %1917 = vmatprep.subr.bf16.mxu1 %v2611_v43  ;;  %v2695_v42 = vld [vmem:[#allocation5 + $0x63c] ss:$24 sps:$4 sm:$0xff]   ;;  %v2690_v43 = vld [vmem:[#allocation5 + $0x338] ss:$24 sps:$4 sm:$0xff]  }
  0x7c   :  { %1877 = vmatpush2.bf16.msra.mxu0 %v2606_v44  ;;  %v2693_v44 = vld [vmem:[#allocation5 + $0x638] ss:$24 sps:$4 sm:$0xff]  }
  0x7d   :  { %1918 = vmatpush2.bf16.msra.mxu1 %v2609_v45  ;;  %1878 = vmatprep.subr.bf16.mxu0 %v2614_v46  ;;  %v2698_v45 = vld [vmem:[#allocation5 + $0x30c] ss:$24 sps:$4 sm:$0xff]  }
  0x7e   :  { %1919 = vmatprep.subr.bf16.mxu1 %v2617_v47  ;;  %v2701_v46 = vld [vmem:[#allocation5 + $0x60c] ss:$24 sps:$4 sm:$0xff]   ;;  %v2696_v47 = vld [vmem:[#allocation5 + $0x308] ss:$24 sps:$4 sm:$0xff]  }
  0x80   :  { %1879 = vmatpush2.bf16.msra.mxu0 %v2612_v48  ;;  %v2699_v48 = vld [vmem:[#allocation5 + $0x608] ss:$24 sps:$4 sm:$0xff]  }
  0x81   :  { %1920 = vmatpush2.bf16.msra.mxu1 %v2615_v50  ;;  %1880 = vmatprep.subr.bf16.mxu0 %v2620_v51  ;;  %v2704_v50 = vld [vmem:[#allocation5 + $0x5dc] ss:$24 sps:$4 sm:$0xff]  }
  0x82   :  { %1921 = vmatprep.subr.bf16.mxu1 %v2623_v53  ;;  %v2707_v51 = vld [vmem:[#allocation5 + $0x8dc] ss:$24 sps:$4 sm:$0xff]   ;;  %v2702_v53 = vld [vmem:[#allocation5 + $0x5d8] ss:$24 sps:$4 sm:$0xff]  }
  0x84   :  { %1881 = vmatpush2.bf16.msra.mxu0 %v2618_v54  ;;  %v2705_v54 = vld [vmem:[#allocation5 + $0x8d8] ss:$24 sps:$4 sm:$0xff]  }
  0x85   :  { %1922 = vmatpush2.bf16.msra.mxu1 %v2621_v55  ;;  %1882 = vmatprep.subr.bf16.mxu0 %v2626_v56  ;;  %v2710_v55 = vld [vmem:[#allocation5 + $0x5ac] ss:$24 sps:$4 sm:$0xff]  }
  0x86   :  { %1923 = vmatprep.subr.bf16.mxu1 %v2629_v57  ;;  %v2713_v56 = vld [vmem:[#allocation5 + $0x8ac] ss:$24 sps:$4 sm:$0xff]   ;;  %v2708_v57 = vld [vmem:[#allocation5 + $0x5a8] ss:$24 sps:$4 sm:$0xff]  }
  0x88   :  { %1883 = vmatpush2.bf16.msra.mxu0 %v2624_v58  ;;  %v2711_v58 = vld [vmem:[#allocation5 + $0x8a8] ss:$24 sps:$4 sm:$0xff]  }
  0x89   :  { %1924 = vmatpush2.bf16.msra.mxu1 %v2627_v59  ;;  %1884 = vmatprep.subr.bf16.mxu0 %v2632_v60  ;;  %v2716_v59 = vld [vmem:[#allocation5 + $0x57c] ss:$24 sps:$4 sm:$0xff]  }
  0x8a   :  { %1925 = vmatprep.subr.bf16.mxu1 %v2635_v61  ;;  %v2719_v60 = vld [vmem:[#allocation5 + $0x87c] ss:$24 sps:$4 sm:$0xff]   ;;  %v2714_v61 = vld [vmem:[#allocation5 + $0x578] ss:$24 sps:$4 sm:$0xff]  }
  0x8c   :  { %1885 = vmatpush2.bf16.msra.mxu0 %v2630_v62  ;;  %v2717_v62 = vld [vmem:[#allocation5 + $0x878] ss:$24 sps:$4 sm:$0xff]  }
  0x8d   :  { %1926 = vmatpush2.bf16.msra.mxu1 %v2633_v63  ;;  %1886 = vmatprep.subr.bf16.mxu0 %v2638_v0  ;;  %v2722_v63 = vld [vmem:[#allocation5 + $0x54c] ss:$24 sps:$4 sm:$0xff]  }
  0x8e   :  { %1927 = vmatprep.subr.bf16.mxu1 %v2641_v1  ;;  %v2725_v0 = vld [vmem:[#allocation5 + $0x84c] ss:$24 sps:$4 sm:$0xff]   ;;  %v2720_v1 = vld [vmem:[#allocation5 + $0x548] ss:$24 sps:$4 sm:$0xff]  }
  0x90   :  { %1887 = vmatpush2.bf16.msra.mxu0 %v2636_v2  ;;  %v2723_v2 = vld [vmem:[#allocation5 + $0x848] ss:$24 sps:$4 sm:$0xff]  }
  0x91   :  { %1928 = vmatpush2.bf16.msra.mxu1 %v2639_v3  ;;  %1888 = vmatprep.subr.bf16.mxu0 %v2644_v4  ;;  %v2728_v3 = vld [vmem:[#allocation5 + $0x51c] ss:$24 sps:$4 sm:$0xff]  }
  0x92   :  { %1929 = vmatprep.subr.bf16.mxu1 %v2647_v5  ;;  %v2731_v4 = vld [vmem:[#allocation5 + $0x81c] ss:$24 sps:$4 sm:$0xff]   ;;  %v2726_v5 = vld [vmem:[#allocation5 + $0x518] ss:$24 sps:$4 sm:$0xff]  }
  0x94   :  { %1889 = vmatpush2.bf16.msra.mxu0 %v2642_v6  ;;  %v2729_v6 = vld [vmem:[#allocation5 + $0x818] ss:$24 sps:$4 sm:$0xff]  }
  0x95   :  { %1930 = vmatpush2.bf16.msra.mxu1 %v2645_v7  ;;  %1890 = vmatprep.subr.bf16.mxu0 %v2650_v10  ;;  %v2734_v7 = vld [vmem:[#allocation5 + $0x4ec] ss:$24 sps:$4 sm:$0xff]  }
  0x96   :  { %1931 = vmatprep.subr.bf16.mxu1 %v2653_v11  ;;  %v2737_v10 = vld [vmem:[#allocation5 + $0x7ec] ss:$24 sps:$4 sm:$0xff]   ;;  %v2732_v11 = vld [vmem:[#allocation5 + $0x4e8] ss:$24 sps:$4 sm:$0xff]  }
  0x98   :  { %1891 = vmatpush2.bf16.msra.mxu0 %v2648_v12  ;;  %v2735_v12 = vld [vmem:[#allocation5 + $0x7e8] ss:$24 sps:$4 sm:$0xff]  }
  0x99   :  { %1932 = vmatpush2.bf16.msra.mxu1 %v2651_v13  ;;  %1942 = vmatprep.subr.bf16.mxu0 %v2656_v15  ;;  %v2740_v13 = vld [vmem:[#allocation5 + $0x4bc] ss:$24 sps:$4 sm:$0xff]   ;;  %v2738_v15 = vld [vmem:[#allocation5 + $0x4b8] ss:$24 sps:$4 sm:$0xff]  }
  0x9a   :  { %1983 = vmatprep.subr.bf16.mxu1 %v2659_v16  ;;  %v2741_v16 = vld [vmem:[#allocation5 + $0x7b8] ss:$24 sps:$4 sm:$0xff]  }
  0x9b   :  { %1893 = vmatmul.mubr.bf16.vlgmr.msra.gmra.mxu0 %v3002_v17 }
  0x9c   :  { %1934 = vmatmul.mubr.bf16.vlgmr.msra.gmra.mxu1 %v2992_v8  ;;  %1943 = vmatpush1.bf16.msra.mxu0 %v2654_v18  ;;  %v2746_v18 = vld [vmem:[#allocation5 + $0x48c] ss:$24 sps:$4 sm:$0xff]  }
  0x9d   :  { %1984 = vmatpush1.bf16.msra.mxu1 %v2657_v19  ;;  %1944 = vmatprep.subr.bf16.mxu0 %v2662_v20  ;;  %v2749_v19 = vld [vmem:[#allocation5 + $0x78c] ss:$24 sps:$4 sm:$0xff]   ;;  %v2744_v20 = vld [vmem:[#allocation5 + $0x488] ss:$24 sps:$4 sm:$0xff]  }
  0x9e   :  { %1985 = vmatprep.subr.bf16.mxu1 %v2665_v21  ;;  %1974 = vmatprep.mubr.bf16.mxu0 %v2988_v52  ;;  %v2747_v21 = vld [vmem:[#allocation5 + $0x788] ss:$24 sps:$4 sm:$0xff]  }
  0x9f   :  { %2015 = vmatprep.mubr.bf16.mxu1 %v2999_v35 }
  0xa0   :  { %1945 = vmatpush1.bf16.msra.mxu0 %v2660_v22  ;;  %v2752_v22 = vld [vmem:[#allocation5 + $0x164] ss:$24 sps:$4 sm:$0xff]  }
  0xa1   :  { %1986 = vmatpush1.bf16.msra.mxu1 %v2663_v23  ;;  %1946 = vmatprep.subr.bf16.mxu0 %v2668_v24  ;;  %v2755_v23 = vld [vmem:[#allocation5 + $0x464] ss:$24 sps:$4 sm:$0xff]   ;;  %v2750_v24 = vld [vmem:[#allocation5 + $0x160] ss:$24 sps:$4 sm:$0xff]  }
  0xa2   :  { %1987 = vmatprep.subr.bf16.mxu1 %v2671_v25  ;;  %v2753_v25 = vld [vmem:[#allocation5 + $0x460] ss:$24 sps:$4 sm:$0xff]  }
  0xa4   :  { %1947 = vmatpush1.bf16.msra.mxu0 %v2666_v26  ;;  %v2758_v26 = vld [vmem:[#allocation5 + $0x134] ss:$24 sps:$4 sm:$0xff]  }
  0xa5   :  { %1988 = vmatpush1.bf16.msra.mxu1 %v2669_v27  ;;  %1948 = vmatprep.subr.bf16.mxu0 %v2674_v28  ;;  %v2761_v27 = vld [vmem:[#allocation5 + $0x434] ss:$24 sps:$4 sm:$0xff]   ;;  %v2756_v28 = vld [vmem:[#allocation5 + $0x130] ss:$24 sps:$4 sm:$0xff]  }
  0xa6   :  { %1989 = vmatprep.subr.bf16.mxu1 %v2677_v29  ;;  %v2759_v29 = vld [vmem:[#allocation5 + $0x430] ss:$24 sps:$4 sm:$0xff]  }
  0xa8   :  { %1949 = vmatpush1.bf16.msra.mxu0 %v2672_v30  ;;  %v2764_v30 = vld [vmem:[#allocation5 + $0x104] ss:$24 sps:$4 sm:$0xff]  }
  0xa9   :  { %1990 = vmatpush1.bf16.msra.mxu1 %v2675_v31  ;;  %1950 = vmatprep.subr.bf16.mxu0 %v2680_v32  ;;  %v2767_v31 = vld [vmem:[#allocation5 + $0x404] ss:$24 sps:$4 sm:$0xff]   ;;  %v2762_v32 = vld [vmem:[#allocation5 + $0x100] ss:$24 sps:$4 sm:$0xff]  }
  0xaa   :  { %1991 = vmatprep.subr.bf16.mxu1 %v2683_v33  ;;  %v2765_v33 = vld [vmem:[#allocation5 + $0x400] ss:$24 sps:$4 sm:$0xff]  }
  0xac   :  { %1951 = vmatpush1.bf16.msra.mxu0 %v2678_v34  ;;  %v2770_v34 = vld [vmem:[#allocation5 + $0xd4] ss:$24 sps:$4 sm:$0xff]  }
  0xad   :  { %1992 = vmatpush1.bf16.msra.mxu1 %v2681_v36  ;;  %1952 = vmatprep.subr.bf16.mxu0 %v2686_v37  ;;  %v2773_v36 = vld [vmem:[#allocation5 + $0x3d4] ss:$24 sps:$4 sm:$0xff]   ;;  %v2768_v37 = vld [vmem:[#allocation5 + $0xd0] ss:$24 sps:$4 sm:$0xff]  }
  0xae   :  { %1993 = vmatprep.subr.bf16.mxu1 %v2689_v38  ;;  %v2771_v38 = vld [vmem:[#allocation5 + $0x3d0] ss:$24 sps:$4 sm:$0xff]  }
  0xb0   :  { %1953 = vmatpush1.bf16.msra.mxu0 %v2684_v39  ;;  %v2776_v39 = vld [vmem:[#allocation5 + $0xa4] ss:$24 sps:$4 sm:$0xff]  }
  0xb1   :  { %1994 = vmatpush1.bf16.msra.mxu1 %v2687_v40  ;;  %1954 = vmatprep.subr.bf16.mxu0 %v2692_v41  ;;  %v2779_v40 = vld [vmem:[#allocation5 + $0x3a4] ss:$24 sps:$4 sm:$0xff]   ;;  %v2782_v41 = vld [vmem:[#allocation5 + $0x74] ss:$24 sps:$4 sm:$0xff]  }
  0xb2   :  { %1995 = vmatprep.subr.bf16.mxu1 %v2695_v42  ;;  %v2785_v42 = vld [vmem:[#allocation5 + $0x374] ss:$24 sps:$4 sm:$0xff]  }
  0xb4   :  { %1955 = vmatpush1.bf16.msra.mxu0 %v2690_v43  ;;  %v2780_v43 = vld [vmem:[#allocation5 + $0x70] ss:$24 sps:$4 sm:$0xff]  }
  0xb5   :  { %1996 = vmatpush1.bf16.msra.mxu1 %v2693_v44  ;;  %1956 = vmatprep.subr.bf16.mxu0 %v2698_v45  ;;  %v2783_v44 = vld [vmem:[#allocation5 + $0x370] ss:$24 sps:$4 sm:$0xff]   ;;  %v2788_v45 = vld [vmem:[#allocation5 + $0x44] ss:$24 sps:$4 sm:$0xff]  }
  0xb6   :  { %1997 = vmatprep.subr.bf16.mxu1 %v2701_v46  ;;  %v2791_v46 = vld [vmem:[#allocation5 + $0x344] ss:$24 sps:$4 sm:$0xff]  }
  0xb8   :  { %1957 = vmatpush1.bf16.msra.mxu0 %v2696_v47  ;;  %v2786_v47 = vld [vmem:[#allocation5 + $0x40] ss:$24 sps:$4 sm:$0xff]  }
  0xb9   :  { %1998 = vmatpush1.bf16.msra.mxu1 %v2699_v48  ;;  %1958 = vmatprep.subr.bf16.mxu0 %v2704_v50  ;;  %v2789_v48 = vld [vmem:[#allocation5 + $0x340] ss:$24 sps:$4 sm:$0xff]   ;;  %v2794_v50 = vld [vmem:[#allocation5 + $0x14] ss:$24 sps:$4 sm:$0xff]  }
  0xba   :  { %1999 = vmatprep.subr.bf16.mxu1 %v2707_v51  ;;  %v2797_v51 = vld [vmem:[#allocation5 + $0x314] ss:$24 sps:$4 sm:$0xff]  }
  0xbc   :  { %1959 = vmatpush2.bf16.msra.mxu0 %v2702_v53  ;;  %v2792_v53 = vld [vmem:[#allocation5 + $0x10] ss:$24 sps:$4 sm:$0xff]  }
  0xbd   :  { %2000 = vmatpush2.bf16.msra.mxu1 %v2705_v54  ;;  %1960 = vmatprep.subr.bf16.mxu0 %v2710_v55  ;;  %v2795_v54 = vld [vmem:[#allocation5 + $0x310] ss:$24 sps:$4 sm:$0xff]   ;;  %v2800_v55 = vld [vmem:[#allocation5 + $0x2e4] ss:$24 sps:$4 sm:$0xff]  }
  0xbe   :  { %2001 = vmatprep.subr.bf16.mxu1 %v2713_v56  ;;  %v2803_v56 = vld [vmem:[#allocation5 + $0x5e4] ss:$24 sps:$4 sm:$0xff]  }
  0xc0   :  { %1961 = vmatpush2.bf16.msra.mxu0 %v2708_v57  ;;  %v2798_v57 = vld [vmem:[#allocation5 + $0x2e0] ss:$24 sps:$4 sm:$0xff]  }
  0xc1   :  { %2002 = vmatpush2.bf16.msra.mxu1 %v2711_v58  ;;  %1962 = vmatprep.subr.bf16.mxu0 %v2716_v59  ;;  %v2801_v58 = vld [vmem:[#allocation5 + $0x5e0] ss:$24 sps:$4 sm:$0xff]   ;;  %v2806_v59 = vld [vmem:[#allocation5 + $0x2b4] ss:$24 sps:$4 sm:$0xff]  }
  0xc2   :  { %2003 = vmatprep.subr.bf16.mxu1 %v2719_v60  ;;  %v2809_v60 = vld [vmem:[#allocation5 + $0x5b4] ss:$24 sps:$4 sm:$0xff]  }
  0xc4   :  { %1963 = vmatpush2.bf16.msra.mxu0 %v2714_v61  ;;  %v2804_v61 = vld [vmem:[#allocation5 + $0x2b0] ss:$24 sps:$4 sm:$0xff]  }
  0xc5   :  { %2004 = vmatpush2.bf16.msra.mxu1 %v2717_v62  ;;  %1964 = vmatprep.subr.bf16.mxu0 %v2722_v63  ;;  %v2807_v62 = vld [vmem:[#allocation5 + $0x5b0] ss:$24 sps:$4 sm:$0xff]   ;;  %v2812_v63 = vld [vmem:[#allocation5 + $0x284] ss:$24 sps:$4 sm:$0xff]  }
  0xc6   :  { %2005 = vmatprep.subr.bf16.mxu1 %v2725_v0  ;;  %v2815_v0 = vld [vmem:[#allocation5 + $0x584] ss:$24 sps:$4 sm:$0xff]  }
  0xc8   :  { %1965 = vmatpush2.bf16.msra.mxu0 %v2720_v1  ;;  %v2810_v1 = vld [vmem:[#allocation5 + $0x280] ss:$24 sps:$4 sm:$0xff]  }
  0xc9   :  { %2006 = vmatpush2.bf16.msra.mxu1 %v2723_v2  ;;  %1966 = vmatprep.subr.bf16.mxu0 %v2728_v3  ;;  %v2813_v2 = vld [vmem:[#allocation5 + $0x580] ss:$24 sps:$4 sm:$0xff]   ;;  %v2818_v3 = vld [vmem:[#allocation5 + $0x254] ss:$24 sps:$4 sm:$0xff]  }
  0xca   :  { %2007 = vmatprep.subr.bf16.mxu1 %v2731_v4  ;;  %v2821_v4 = vld [vmem:[#allocation5 + $0x554] ss:$24 sps:$4 sm:$0xff]  }
  0xcc   :  { %1967 = vmatpush2.bf16.msra.mxu0 %v2726_v5  ;;  %v2816_v5 = vld [vmem:[#allocation5 + $0x250] ss:$24 sps:$4 sm:$0xff]  }
  0xcd   :  { %2008 = vmatpush2.bf16.msra.mxu1 %v2729_v6  ;;  %1968 = vmatprep.subr.bf16.mxu0 %v2734_v7  ;;  %v2819_v6 = vld [vmem:[#allocation5 + $0x550] ss:$24 sps:$4 sm:$0xff]   ;;  %v2824_v7 = vld [vmem:[#allocation5 + $0x224] ss:$24 sps:$4 sm:$0xff]  }
  0xce   :  { %2009 = vmatprep.subr.bf16.mxu1 %v2737_v10  ;;  %v2827_v10 = vld [vmem:[#allocation5 + $0x524] ss:$24 sps:$4 sm:$0xff]  }
  0xd0   :  { %1969 = vmatpush2.bf16.msra.mxu0 %v2732_v11  ;;  %v2822_v11 = vld [vmem:[#allocation5 + $0x220] ss:$24 sps:$4 sm:$0xff]  }
  0xd1   :  { %2010 = vmatpush2.bf16.msra.mxu1 %v2735_v12  ;;  %1970 = vmatprep.subr.bf16.mxu0 %v2740_v13  ;;  %v2825_v12 = vld [vmem:[#allocation5 + $0x520] ss:$24 sps:$4 sm:$0xff]   ;;  %v2830_v13 = vld [vmem:[#allocation5 + $0x1f4] ss:$24 sps:$4 sm:$0xff]  }
  0xd2   :  { %2011 = vmatprep.subr.bf16.mxu1 %v2743_v14  ;;  %v2833_v14 = vld [vmem:[#allocation5 + $0x4f4] ss:$24 sps:$4 sm:$0xff]  }
  0xd4   :  { %1971 = vmatpush2.bf16.msra.mxu0 %v2738_v15  ;;  %v2828_v15 = vld [vmem:[#allocation5 + $0x1f0] ss:$24 sps:$4 sm:$0xff]  }
  0xd5   :  { %2012 = vmatpush2.bf16.msra.mxu1 %v2741_v16  ;;  %1972 = vmatprep.subr.bf16.mxu0 %v2746_v18  ;;  %v2831_v16 = vld [vmem:[#allocation5 + $0x4f0] ss:$24 sps:$4 sm:$0xff]   ;;  %v2836_v18 = vld [vmem:[#allocation5 + $0x1c4] ss:$24 sps:$4 sm:$0xff]  }
  0xd6   :  { %2013 = vmatprep.subr.bf16.mxu1 %v2749_v19  ;;  %v2839_v19 = vld [vmem:[#allocation5 + $0x4c4] ss:$24 sps:$4 sm:$0xff]  }
  0xd8   :  { %1973 = vmatpush2.bf16.msra.mxu0 %v2744_v20  ;;  %v2834_v20 = vld [vmem:[#allocation5 + $0x1c0] ss:$24 sps:$4 sm:$0xff]  }
  0xd9   :  { %2014 = vmatpush2.bf16.msra.mxu1 %v2747_v21  ;;  %2024 = vmatprep.subr.bf16.mxu0 %v2752_v22  ;;  %v2837_v21 = vld [vmem:[#allocation5 + $0x4c0] ss:$24 sps:$4 sm:$0xff]   ;;  %v2842_v22 = vld [vmem:[#allocation5 + $0x194] ss:$24 sps:$4 sm:$0xff]  }
  0xda   :  { %2065 = vmatprep.subr.bf16.mxu1 %v2755_v23  ;;  %v2845_v23 = vld [vmem:[#allocation5 + $0x494] ss:$24 sps:$4 sm:$0xff]  }
  0xdb   :  { %1975 = vmatmul.mubr.bf16.vlgmr.msra.gmra.mxu0 %v2994_v9 }
  0xdc   :  { %2016 = vmatmul.mubr.bf16.vlgmr.msra.gmra.mxu1 %v3002_v17  ;;  %2025 = vmatpush1.bf16.msra.mxu0 %v2750_v24  ;;  %v2840_v24 = vld [vmem:[#allocation5 + $0x190] ss:$24 sps:$4 sm:$0xff]  }
  0xdd   :  { %2066 = vmatpush1.bf16.msra.mxu1 %v2753_v25  ;;  %2026 = vmatprep.subr.bf16.mxu0 %v2758_v26  ;;  %v2843_v25 = vld [vmem:[#allocation5 + $0x490] ss:$24 sps:$4 sm:$0xff]   ;;  %v2848_v26 = vld [vmem:[#allocation5 + $0x764] ss:$24 sps:$4 sm:$0xff]  }
  0xde   :  { %2067 = vmatprep.subr.bf16.mxu1 %v2761_v27  ;;  %2056 = vmatprep.mubr.bf16.mxu0 %v2986_v49  ;;  %v2774_v49 = vld [vmem:[#allocation5 + $0xa0] ss:$24 sps:$4 sm:$0xff]  }
  0xdf   :  { %2097 = vmatprep.mubr.bf16.mxu1 %v2988_v52  ;;  %v2777_v52 = vld [vmem:[#allocation5 + $0x3a0] ss:$24 sps:$4 sm:$0xff]  }
  0xe0   :  { %2027 = vmatpush1.bf16.msra.mxu0 %v2756_v28  ;;  %v2846_v27 = vld [vmem:[#allocation5 + $0x760] ss:$24 sps:$4 sm:$0xff]   ;;  %v2851_v28 = vld [vmem:[#allocation5 + $0x734] ss:$24 sps:$4 sm:$0xff]  }
  0xe1   :  { %2068 = vmatpush1.bf16.msra.mxu1 %v2759_v29  ;;  %2028 = vmatprep.subr.bf16.mxu0 %v2764_v30 }
  0xe2   :  { %2069 = vmatprep.subr.bf16.mxu1 %v2767_v31  ;;  %v2849_v31 = vld [vmem:[#allocation5 + $0x730] ss:$24 sps:$4 sm:$0xff]  }
  0xe4   :  { %2029 = vmatpush1.bf16.msra.mxu0 %v2762_v32 }
  0xe5   :  { %2070 = vmatpush1.bf16.msra.mxu1 %v2765_v33  ;;  %2030 = vmatprep.subr.bf16.mxu0 %v2770_v34  ;;  %v2854_v34 = vld [vmem:[#allocation5 + $0x704] ss:$24 sps:$4 sm:$0xff]  }
  0xe6   :  { %2071 = vmatprep.subr.bf16.mxu1 %v2773_v36 }
  0xe8   :  { %2031 = vmatpush1.bf16.msra.mxu0 %v2768_v37 }
  0xe9   :  { %2072 = vmatpush1.bf16.msra.mxu1 %v2771_v38  ;;  %2032 = vmatprep.subr.bf16.mxu0 %v2776_v39  ;;  %v2852_v38 = vld [vmem:[#allocation5 + $0x700] ss:$24 sps:$4 sm:$0xff]  }
  0xea   :  { %2073 = vmatprep.subr.bf16.mxu1 %v2779_v40  ;;  %v2857_v40 = vld [vmem:[#allocation5 + $0x6d4] ss:$24 sps:$4 sm:$0xff]  }
  0xec   :  { %2033 = vmatpush1.bf16.msra.mxu0 %v2774_v49  ;;  %v2860_v49 = vld [vmem:[#allocation5 + $0x6a4] ss:$24 sps:$4 sm:$0xff]  }
  0xed   :  { %2074 = vmatpush1.bf16.msra.mxu1 %v2777_v52  ;;  %2034 = vmatprep.subr.bf16.mxu0 %v2782_v41  ;;  %v2863_v52 = vld [vmem:[#allocation5 + $0x674] ss:$24 sps:$4 sm:$0xff]   ;;  %v2861_v41 = vld [vmem:[#allocation5 + $0x670] ss:$24 sps:$4 sm:$0xff]  }
  0xee   :  { %2075 = vmatprep.subr.bf16.mxu1 %v2785_v42  ;;  %v2866_v42 = vld [vmem:[#allocation5 + $0x644] ss:$24 sps:$4 sm:$0xff]  }
  0xf0   :  { %2035 = vmatpush1.bf16.msra.mxu0 %v2780_v43  ;;  %v2864_v43 = vld [vmem:[#allocation5 + $0x640] ss:$24 sps:$4 sm:$0xff]  }
  0xf1   :  { %2076 = vmatpush1.bf16.msra.mxu1 %v2783_v44  ;;  %2036 = vmatprep.subr.bf16.mxu0 %v2788_v45  ;;  %v2869_v44 = vld [vmem:[#allocation5 + $0x614] ss:$24 sps:$4 sm:$0xff]   ;;  %v2867_v45 = vld [vmem:[#allocation5 + $0x610] ss:$24 sps:$4 sm:$0xff]  }
  0xf2   :  { %2077 = vmatprep.subr.bf16.mxu1 %v2791_v46  ;;  %v2872_v46 = vld [vmem:[#allocation5 + $0x8e4] ss:$24 sps:$4 sm:$0xff]  }
  0xf4   :  { %2037 = vmatpush1.bf16.msra.mxu0 %v2786_v47  ;;  %v2870_v47 = vld [vmem:[#allocation5 + $0x8e0] ss:$24 sps:$4 sm:$0xff]  }
  0xf5   :  { %2078 = vmatpush1.bf16.msra.mxu1 %v2789_v48  ;;  %2038 = vmatprep.subr.bf16.mxu0 %v2794_v50  ;;  %v2875_v48 = vld [vmem:[#allocation5 + $0x8b4] ss:$24 sps:$4 sm:$0xff]   ;;  %v2873_v50 = vld [vmem:[#allocation5 + $0x8b0] ss:$24 sps:$4 sm:$0xff]  }
  0xf6   :  { %2079 = vmatprep.subr.bf16.mxu1 %v2797_v51  ;;  %v2878_v51 = vld [vmem:[#allocation5 + $0x884] ss:$24 sps:$4 sm:$0xff]  }
  0xf8   :  { %2039 = vmatpush1.bf16.msra.mxu0 %v2792_v53  ;;  %v2876_v53 = vld [vmem:[#allocation5 + $0x880] ss:$24 sps:$4 sm:$0xff]  }
  0xf9   :  { %2080 = vmatpush1.bf16.msra.mxu1 %v2795_v54  ;;  %2040 = vmatprep.subr.bf16.mxu0 %v2800_v55  ;;  %v2881_v54 = vld [vmem:[#allocation5 + $0x854] ss:$24 sps:$4 sm:$0xff]   ;;  %v2879_v55 = vld [vmem:[#allocation5 + $0x850] ss:$24 sps:$4 sm:$0xff]  }
  0xfa   :  { %2081 = vmatprep.subr.bf16.mxu1 %v2803_v56  ;;  %v2884_v56 = vld [vmem:[#allocation5 + $0x824] ss:$24 sps:$4 sm:$0xff]  }
  0xfc   :  { %2041 = vmatpush2.bf16.msra.mxu0 %v2798_v57  ;;  %v2882_v57 = vld [vmem:[#allocation5 + $0x820] ss:$24 sps:$4 sm:$0xff]  }
  0xfd   :  { %2082 = vmatpush2.bf16.msra.mxu1 %v2801_v58  ;;  %2042 = vmatprep.subr.bf16.mxu0 %v2806_v59  ;;  %v2887_v58 = vld [vmem:[#allocation5 + $0x7f4] ss:$24 sps:$4 sm:$0xff]   ;;  %v2885_v59 = vld [vmem:[#allocation5 + $0x7f0] ss:$24 sps:$4 sm:$0xff]  }
  0xfe   :  { %2083 = vmatprep.subr.bf16.mxu1 %v2809_v60  ;;  %v2890_v60 = vld [vmem:[#allocation5 + $0x7c4] ss:$24 sps:$4 sm:$0xff]  }
 0x100   :  { %2043 = vmatpush2.bf16.msra.mxu0 %v2804_v61  ;;  %v2888_v61 = vld [vmem:[#allocation5 + $0x7c0] ss:$24 sps:$4 sm:$0xff]  }
 0x101   :  { %2084 = vmatpush2.bf16.msra.mxu1 %v2807_v62  ;;  %2044 = vmatprep.subr.bf16.mxu0 %v2812_v63  ;;  %v2893_v62 = vld [vmem:[#allocation5 + $0x794] ss:$24 sps:$4 sm:$0xff]   ;;  %v2891_v63 = vld [vmem:[#allocation5 + $0x790] ss:$24 sps:$4 sm:$0xff]  }
 0x102   :  { %2085 = vmatprep.subr.bf16.mxu1 %v2815_v0 }
 0x104   :  { %2045 = vmatpush2.bf16.msra.mxu0 %v2810_v1 }
 0x105   :  { %2086 = vmatpush2.bf16.msra.mxu1 %v2813_v2  ;;  %2046 = vmatprep.subr.bf16.mxu0 %v2818_v3 }
 0x106   :  { %2087 = vmatprep.subr.bf16.mxu1 %v2821_v4 }
 0x108   :  { %2047 = vmatpush2.bf16.msra.mxu0 %v2816_v5 }
 0x109   :  { %2088 = vmatpush2.bf16.msra.mxu1 %v2819_v6  ;;  %2048 = vmatprep.subr.bf16.mxu0 %v2824_v7 }
 0x10a   :  { %2089 = vmatprep.subr.bf16.mxu1 %v2827_v10 }
 0x10c   :  { %2049 = vmatpush2.bf16.msra.mxu0 %v2822_v11 }
 0x10d   :  { %2090 = vmatpush2.bf16.msra.mxu1 %v2825_v12  ;;  %2050 = vmatprep.subr.bf16.mxu0 %v2830_v13 }
 0x10e   :  { %2091 = vmatprep.subr.bf16.mxu1 %v2833_v14 }
 0x110   :  { %2051 = vmatpush2.bf16.msra.mxu0 %v2828_v15 }
 0x111   :  { %2092 = vmatpush2.bf16.msra.mxu1 %v2831_v16  ;;  %2052 = vmatprep.subr.bf16.mxu0 %v2836_v18 }
 0x112   :  { %2093 = vmatprep.subr.bf16.mxu1 %v2839_v19 }
 0x114   :  { %2053 = vmatpush2.bf16.msra.mxu0 %v2834_v20 }
 0x115   :  { %2094 = vmatpush2.bf16.msra.mxu1 %v2837_v21  ;;  %2054 = vmatprep.subr.bf16.mxu0 %v2842_v22 }
 0x116   :  { %2095 = vmatprep.subr.bf16.mxu1 %v2845_v23 }
 0x118   :  { %2055 = vmatpush2.bf16.msra.mxu0 %v2840_v24 }
 0x119   :  { %2096 = vmatpush2.bf16.msra.mxu1 %v2843_v25  ;;  %2106 = vmatprep.subr.bf16.mxu0 %v2848_v26 }
 0x11b   :  { %v3012_v29 = vpop.f32.mrf.mxu0  ;;  %2057 = vmatmul.mubr.bf16.vlgmr.msra.gmra.mxu0 %v2992_v8 }
 0x11c   :  { %v3014_v30 = vpop.f32.mrf.mxu1  ;;  %2098 = vmatmul.mubr.bf16.vlgmr.msra.gmra.mxu1 %v2994_v9  ;;  %2107 = vmatpush1.bf16.msra.mxu0 %v2846_v27  ;;  %v2855_v9 = vld [vmem:[#allocation5 + $0x6d0] ss:$24 sps:$4 sm:$0xff]  }
 0x11d   :  { %2138 = vmatprep.mubr.bf16.mxu0 %v2999_v35  ;;  %v3019_v32 = vpop.f32.mrf.mxu0  ;;  %2108 = vmatprep.subr.bf16.mxu0 %v2851_v28  ;;  %v2858_v35 = vld [vmem:[#allocation5 + $0x6a0] ss:$24 sps:$4 sm:$0xff]   ;;  %v1854_v0 = vadd.f32 %v3014_v30, %v3012_v29 }
 0x11e   :  { %v3021_v33 = vpop.f32.mrf.mxu1 }
 0x11f   :  { %v1816_v36 = vpop.f32.mrf.mxu0  ;;  %v1856_v3 = vadd.f32 %v3021_v33, %v3019_v32 }
 0x120   :  { %v1857_v37 = vpop.f32.mrf.mxu1  ;;  %2109 = vmatpush1.bf16.msra.mxu0 %v2849_v31 }
 0x121   :  { %v1817_v39 = vpop.f32.mrf.mxu0  ;;  %2110 = vmatprep.subr.bf16.mxu0 %v2854_v34 }
 0x122   :  { %v1858_v8 = vpop.f32.mrf.mxu1 }
 0x124   :  { %2111 = vmatpush1.bf16.msra.mxu0 %v2852_v38 }
 0x125   :  { %2112 = vmatprep.subr.bf16.mxu0 %v2857_v40 }
 0x128   :  { %2113 = vmatpush1.bf16.msra.mxu0 %v2855_v9 }
 0x129   :  { %2114 = vmatprep.subr.bf16.mxu0 %v2860_v49 }
 0x12c   :  { %2115 = vmatpush1.bf16.msra.mxu0 %v2858_v35 }
 0x12d   :  { %2116 = vmatprep.subr.bf16.mxu0 %v2863_v52 }
 0x130   :  { %2117 = vmatpush1.bf16.msra.mxu0 %v2861_v41 }
 0x131   :  { %2118 = vmatprep.subr.bf16.mxu0 %v2866_v42 }
 0x134   :  { %2119 = vmatpush1.bf16.msra.mxu0 %v2864_v43 }
 0x135   :  { %2120 = vmatprep.subr.bf16.mxu0 %v2869_v44 }
 0x138   :  { %2121 = vmatpush1.bf16.msra.mxu0 %v2867_v45 }
 0x139   :  { %2122 = vmatprep.subr.bf16.mxu0 %v2872_v46 }
 0x13c   :  { %2123 = vmatpush2.bf16.msra.mxu0 %v2870_v47 }
 0x13d   :  { %2124 = vmatprep.subr.bf16.mxu0 %v2875_v48 }
 0x140   :  { %2125 = vmatpush2.bf16.msra.mxu0 %v2873_v50 }
 0x141   :  { %2126 = vmatprep.subr.bf16.mxu0 %v2878_v51 }
 0x144   :  { %2127 = vmatpush2.bf16.msra.mxu0 %v2876_v53 }
 0x145   :  { %2128 = vmatprep.subr.bf16.mxu0 %v2881_v54 }
 0x148   :  { %2129 = vmatpush2.bf16.msra.mxu0 %v2879_v55 }
 0x149   :  { %2130 = vmatprep.subr.bf16.mxu0 %v2884_v56 }
 0x14c   :  { %2131 = vmatpush2.bf16.msra.mxu0 %v2882_v57 }
 0x14d   :  { %2132 = vmatprep.subr.bf16.mxu0 %v2887_v58 }
 0x150   :  { %2133 = vmatpush2.bf16.msra.mxu0 %v2885_v59 }
 0x151   :  { %2134 = vmatprep.subr.bf16.mxu0 %v2890_v60 }
 0x154   :  { %2135 = vmatpush2.bf16.msra.mxu0 %v2888_v61 }
 0x155   :  { %2136 = vmatprep.subr.bf16.mxu0 %v2893_v62 }
 0x158   :  { %2137 = vmatpush2.bf16.msra.mxu0 %v2891_v63 }
 0x15b   :  { %v1894_v1 = vpop.f32.mrf.mxu0  ;;  %2139 = vmatmul.mubr.bf16.vlgmr.msra.gmra.mxu0 %v3002_v17 }
 0x15c   :  { %v1935_v2 = vpop.f32.mrf.mxu1  ;;  %v1895_v4 = vadd.f32 %v1894_v1, %v1854_v0 }
 0x15d   :  { %v1896_v5 = vpop.f32.mrf.mxu0 }
 0x15e   :  { %v1937_v6 = vpop.f32.mrf.mxu1  ;;  %2147 = vst [vmem:[#allocation7] sm:$0xff] %v1895_v4  ;;  %v1897_v7 = vadd.f32 %v1896_v5, %v1856_v3 }
 0x15f   :  { %v1898_v10 = vpop.f32.mrf.mxu0 }
 0x160   :  { %v1939_v11 = vpop.f32.mrf.mxu1  ;;  %2148 = vst [vmem:[#allocation7 + $0x8] sm:$0xff] %v1897_v7 }
 0x161   :  { %v1899_v12 = vpop.f32.mrf.mxu0 }
 0x162   :  { %v1940_v13 = vpop.f32.mrf.mxu1 }
 0x19b   :  { %v1976_v14 = vpop.f32.mrf.mxu0 }
 0x19c   :  { %v2017_v15 = vpop.f32.mrf.mxu1  ;;  %v1977_v16 = vadd.f32 %v1976_v14, %v1935_v2 }
 0x19d   :  { %v1978_v18 = vpop.f32.mrf.mxu0 }
 0x19e   :  { %v2019_v19 = vpop.f32.mrf.mxu1  ;;  %v1979_v17 = vadd.f32 %v1978_v18, %v1937_v6  ;;  %v2018_v20 = vadd.f32 %v2017_v15, %v1977_v16 }
 0x19f   :  { %v1980_v21 = vpop.f32.mrf.mxu0 }
 0x1a0   :  { %v2021_v22 = vpop.f32.mrf.mxu1  ;;  %2149 = vst [vmem:[#allocation7 + $0x10] sm:$0xff] %v2018_v20  ;;  %v2020_v23 = vadd.f32 %v2019_v19, %v1979_v17 }
 0x1a1   :  { %v1981_v24 = vpop.f32.mrf.mxu0 }
 0x1a2   :  { %v2022_v25 = vpop.f32.mrf.mxu1  ;;  %2150 = vst [vmem:[#allocation7 + $0x18] sm:$0xff] %v2020_v23 }
 0x1db   :  { %v2058_v26 = vpop.f32.mrf.mxu0 }
 0x1dc   :  { %v2099_v27 = vpop.f32.mrf.mxu1 }
 0x1dd   :  { %v2060_v28 = vpop.f32.mrf.mxu0  ;;  %v2100_v34 = vadd.f32 %v2099_v27, %v2058_v26 }
 0x1de   :  { %v2101_v29 = vpop.f32.mrf.mxu1 }
 0x1df   :  { %v2062_v30 = vpop.f32.mrf.mxu0  ;;  %v2102_v37 = vadd.f32 %v2101_v29, %v2060_v28 }
 0x1e0   :  { %v2103_v31 = vpop.f32.mrf.mxu1 }
 0x1e1   :  { %v2063_v32 = vpop.f32.mrf.mxu0 }
 0x1e2   :  { %v2104_v33 = vpop.f32.mrf.mxu1 }
 0x21b   :  { %v2140_v36 = vpop.f32.mrf.mxu0 }
 0x21c   :  { %v2141_v38 = vadd.f32 %v2140_v36, %v2100_v34 }
 0x21d   :  { %v2142_v39 = vpop.f32.mrf.mxu0 }
 0x21e   :  { %2151 = vst [vmem:[#allocation7 + $0x20] sm:$0xff] %v2141_v38  ;;  %v2143_v40 = vadd.f32 %v2142_v39, %v2102_v37 }
 0x21f   :  { %v2144_v8 = vpop.f32.mrf.mxu0 }
 0x220   :  { %2152 = vst [vmem:[#allocation7 + $0x28] sm:$0xff] %v2143_v40 }
 0x221   :  { %v2145_v9 = vpop.f32.mrf.mxu0 }
 0x222   :  { %2945 = shalt.err (!%p2942_p0)
}
 0x223   :  { %2162 = dma.vmem_to_hbm [thread:$0]  %s2160_s1, 768, %s3033_s2, [#allocation4]  }
 0x224   :  { %2958 = dma.done.wait [#allocation4], 768  }
 0x225   :  { %2959 = vsyncadd [#allocation4], 4294966528 }
 0x226   :  { %2166 = vsyncpa [#allocation3], 1 }
 0x227   :  { %2167 = vsyncpa [#allocation6], 1 }
 0x228   :  { %2168 = vsyncpa [#allocation4], 1 }

</bundles_post_ra>
